<compile_context>
chip_gen: v5e
topology: v5e:2x2
jax: 0.10.0
libtpu: 0.0.40
codegen_flags: <defaults>
</compile_context>

<pallas_src>
import functools

import jax
import jax.numpy as jnp
import numpy as np
from jax.experimental import pallas as pl
from jax.experimental.pallas import tpu as pltpu

IN_CH = 128
HIDDEN = 256
OUT_PAD = 128                 # lane width of the fused output slab (lane-dense stores)
NUM_HEADS = 4                 # 0: rot(4), 1: scale(3), 2: opacity(1), 3: rgb(3)
HEAD_OUT = (4, 3, 1, 3)
LANE_OFF = (0, 4, 7, 8)       # lane offset of each head inside the fused 128-lane output
TOTAL_OUT = LANE_OFF[-1] + HEAD_OUT[-1]   # 11 real output lanes


def _round_up(x, m):
    return ((x + m - 1) // m) * m


def _gs_fused_kernel(x_ref, w1_ref, b1_ref, w2_ref, b2_ref, w3_ref, b3_ref, o_ref):
    w1 = w1_ref[...]                                   # (IN_CH, 4*HIDDEN), compute dtype
    cdt = w1.dtype
    x = x_ref[...].astype(cdt)                         # cast f32 rows -> MXU dtype on the tile
    tm = x.shape[0]

    # Stage 1: one wide matmul across all four heads (K=128, N=1024), then one bias+ReLU pass.
    h1 = jnp.dot(x, w1, preferred_element_type=jnp.float32) + b1_ref[...]
    h1 = jnp.maximum(h1, 0.0).astype(cdt)              # (tm, 4*HIDDEN)

    # Stage 2: per-head 256x256 matmuls (block-diagonal structure; fusing these would 4x FLOPs).
    h2s = []
    for h in range(NUM_HEADS):
        h1h = h1[:, h * HIDDEN:(h + 1) * HIDDEN]
        h2 = jnp.dot(h1h, w2_ref[h], preferred_element_type=jnp.float32) + b2_ref[h]
        h2s.append(jnp.maximum(h2, 0.0).astype(cdt))
    h2_cat = jnp.concatenate(h2s, axis=-1)             # (tm, 4*HIDDEN)

    # Stage 3: single long K=1024 matmul against the block-packed last-layer weights.
    # Head h's W3 rows live at h*HIDDEN:(h+1)*HIDDEN and its lanes at LANE_OFF[h], so all
    # heads land in disjoint lanes of one (tm, 128) slab.
    y = jnp.dot(h2_cat, w3_ref[...], preferred_element_type=jnp.float32) + b3_ref[...]

    # Epilogue (all f32). Lane masks are a single-sublane constant, broadcast by where().
    lane = jax.lax.broadcasted_iota(jnp.int32, (1, OUT_PAD), 1)
    is_rot = lane < LANE_OFF[1]                        # lanes 0:4  -> rot
    is_sp = lane < LANE_OFF[2]                         # lanes 4:7  -> scale (given ~is_rot)

    # rot: F.normalize(dim=-1) over the 4 rot lanes (eps=1e-12) via rsqrt (no full-tile divide).
    sumsq = jnp.sum(jnp.where(is_rot, y * y, 0.0), axis=-1, keepdims=True)
    rot = y * jax.lax.rsqrt(jnp.maximum(sumsq, 1e-24))

    # scale: nn.Softplus(beta=100), threshold=20 (linear when beta*y > 20).
    by = 100.0 * y
    sp = jnp.where(by > 20.0, y, jnp.log1p(jnp.exp(jnp.minimum(by, 20.0))) * 0.01)

    # opacity / rgb: sigmoid via one EUP tanh + fma (no exp + full-tile divide).
    sig = 0.5 * (jnp.tanh(0.5 * y) + 1.0)

    out = jnp.where(is_rot, rot, jnp.where(is_sp, sp, sig))
    o_ref[...] = out.astype(o_ref.dtype)


@functools.partial(jax.jit, static_argnames=("tm", "compute_dtype"))
def gs_regresser_forward(rgb_feat, w1c, b1c, w2s, b2s, w3c, b3c, *,
                         tm=1024, compute_dtype=jnp.bfloat16):
    """rgb_feat: (B, N, IN_CH) float32. Returns (rot, scale, opacity, rgb) like the PyTorch module."""
    B, N, C = rgb_feat.shape
    assert C == IN_CH
    M = B * N

    # Row-tile selection: cap so v7x's two TensorCores both get work (>=2 grid steps for
    # large M) and never exceed the (8-rounded) row count for small M.
    tm_eff = min(tm, max(512, _round_up(pl.cdiv(M, 2), 512)))
    tm_eff = min(tm_eff, _round_up(M, 8))
    tm_eff = max(tm_eff, 8)
    grid_m = pl.cdiv(M, tm_eff)

    x = rgb_feat.reshape(M, C)                          # stays f32; cast happens in-kernel

    cdt_bytes = jnp.dtype(compute_dtype).itemsize
    param_bytes = (IN_CH * 4 * HIDDEN + NUM_HEADS * HIDDEN * HIDDEN
                   + 4 * HIDDEN * OUT_PAD) * cdt_bytes + (4 * HIDDEN + NUM_HEADS * HIDDEN
                                                          + OUT_PAD) * 4
    cost = pl.CostEstimate(
        flops=2 * M * (IN_CH * 4 * HIDDEN + NUM_HEADS * HIDDEN * HIDDEN + 4 * HIDDEN * OUT_PAD),
        transcendentals=3 * M * OUT_PAD,
        bytes_accessed=M * IN_CH * 4 + M * OUT_PAD * 4 + param_bytes,
    )

    out = pl.pallas_call(
        _gs_fused_kernel,
        out_shape=jax.ShapeDtypeStruct((M, OUT_PAD), jnp.float32),
        grid=(grid_m,),
        in_specs=[
            pl.BlockSpec((tm_eff, IN_CH), lambda i: (i, 0)),                   # x rows (f32)
            pl.BlockSpec((IN_CH, NUM_HEADS * HIDDEN), lambda i: (0, 0)),       # W1 (head-concat)
            pl.BlockSpec((1, NUM_HEADS * HIDDEN), lambda i: (0, 0)),           # b1 (head-concat)
            pl.BlockSpec((NUM_HEADS, HIDDEN, HIDDEN), lambda i: (0, 0, 0)),    # W2 (stacked)
            pl.BlockSpec((NUM_HEADS, 1, HIDDEN), lambda i: (0, 0, 0)),         # b2 (stacked)
            pl.BlockSpec((NUM_HEADS * HIDDEN, OUT_PAD), lambda i: (0, 0)),     # W3 (block-packed)
            pl.BlockSpec((1, OUT_PAD), lambda i: (0, 0)),                      # b3 (lane-packed)
        ],
        out_specs=pl.BlockSpec((tm_eff, OUT_PAD), lambda i: (i, 0)),
        compiler_params=pltpu.CompilerParams(
            dimension_semantics=("parallel",),
            vmem_limit_bytes=48 * 1024 * 1024),
        cost_estimate=cost,
    )(x,
      w1c.astype(compute_dtype), b1c,
      w2s.astype(compute_dtype), b2s,
      w3c.astype(compute_dtype), b3c)

    # One narrow lane slice of the packed slab, then per-head views of it.
    packed = out[:, :TOTAL_OUT]

    def head(h):
        off, n = LANE_OFF[h], HEAD_OUT[h]
        return packed[:, off:off + n].reshape(B, N, n)

    return head(0), head(1), head(2), head(3)


def _init_head_params(key):
    """Deterministic synthetic per-head parameters (weights stored (in, out) so the
    kernel/ref compute x @ W + b, matching PyTorch's x @ W.T + b)."""
    per_head = []
    for h, out_dim in enumerate(HEAD_OUT):
        k = jax.random.fold_in(key, h)
        k1, k2, k3, k4, k5, k6 = jax.random.split(k, 6)
        w1 = jax.random.normal(k1, (IN_CH, HIDDEN), jnp.float32) * 0.05
        b1 = jax.random.normal(k2, (HIDDEN,), jnp.float32) * 0.01
        w2 = jax.random.normal(k3, (HIDDEN, HIDDEN), jnp.float32) * 0.05
        b2 = jax.random.normal(k4, (HIDDEN,), jnp.float32) * 0.01
        w3 = jax.random.normal(k5, (HIDDEN, out_dim), jnp.float32) * 0.05
        b3 = jax.random.normal(k6, (out_dim,), jnp.float32) * 0.01
        per_head.append((w1, b1, w2, b2, w3, b3))
    return per_head


def _pack_params(per_head):
    """Pack per-head weights for the fused kernel:
       W1/b1: lane-concatenated across heads -> (128, 1024) / (1, 1024)
       W2/b2: stacked along a head axis       -> (4, 256, 256) / (4, 1, 256)
       W3/b3: block-packed so head h's K rows are h*256:(h+1)*256 and its output lanes sit
              at LANE_OFF[h] of the 128-lane slab -> (1024, 128) / (1, 128)."""
    w1c = jnp.concatenate([p[0] for p in per_head], axis=1)
    b1c = jnp.concatenate([p[1] for p in per_head], axis=0)[None, :]
    w2s = jnp.stack([p[2] for p in per_head])
    b2s = jnp.stack([p[3][None, :] for p in per_head])
    w3c = jnp.zeros((NUM_HEADS * HIDDEN, OUT_PAD), jnp.float32)
    b3c = jnp.zeros((OUT_PAD,), jnp.float32)
    for h, p in enumerate(per_head):
        off, n = LANE_OFF[h], HEAD_OUT[h]
        w3c = w3c.at[h * HIDDEN:(h + 1) * HIDDEN, off:off + n].set(p[4])
        b3c = b3c.at[off:off + n].set(p[5])
    return w1c, b1c, w2s, b2s, w3c, b3c[None, :]


def _ref_forward(rgb_feat, per_head):
    """Pure-JAX reference mirroring the PyTorch forward (defaults, rgb=None, xyz=None)."""
    B, N, C = rgb_feat.shape
    x = rgb_feat.reshape(B * N, C).astype(jnp.float32)

    def mlp(h):
        w1, b1, w2, b2, w3, b3 = per_head[h]
        a = jax.nn.relu(x @ w1 + b1)
        a = jax.nn.relu(a @ w2 + b2)
        return a @ w3 + b3

    rot = mlp(0)
    rot = rot / jnp.maximum(jnp.linalg.norm(rot, axis=-1, keepdims=True), 1e-12)
    s = mlp(1)
    scale = jnp.where(100.0 * s > 20.0, s,
                      jnp.log1p(jnp.exp(jnp.minimum(100.0 * s, 20.0))) / 100.0)
    opacity = jax.nn.sigmoid(mlp(2))
    rgb = jax.nn.sigmoid(mlp(3))
    return (rot.reshape(B, N, 4), scale.reshape(B, N, 3),
            opacity.reshape(B, N, 1), rgb.reshape(B, N, 3))


if __name__ == "__main__":
    key = jax.random.PRNGKey(0)
    k_feat, k_par = jax.random.split(key)

    B, N = 2, 8
    rgb_feat = jax.random.normal(k_feat, (B, N, IN_CH), jnp.float32)
    per_head = _init_head_params(k_par)
    packed = _pack_params(per_head)

    # TODO(synk): rgb_embedder / xyz_resi / tanh-opacity-masking paths are unused under the
    # default forward (rgb=None, xyz=None, require_offset=False, opacity_acti='sigmoid')
    # and are not implemented.

    refs = _ref_forward(rgb_feat, per_head)

    # f32 MXU operands: tight check against the f32 reference.
    outs_f32 = gs_regresser_forward(rgb_feat, *packed, tm=1024, compute_dtype=jnp.float32)
    jax.block_until_ready(outs_f32)
    for got, ref in zip(outs_f32, refs):
        np.testing.assert_allclose(np.asarray(got), np.asarray(ref), rtol=1e-5, atol=1e-5)

    # bf16 MXU operands (default; bf16 is native on all of v5e/v6e/v7x): looser tolerance.
    outs_bf16 = gs_regresser_forward(rgb_feat, *packed, tm=1024, compute_dtype=jnp.bfloat16)
    jax.block_until_ready(outs_bf16)
    for got, ref in zip(outs_bf16, refs):
        np.testing.assert_allclose(np.asarray(got), np.asarray(ref), rtol=5e-2, atol=5e-2)

    print("KERNEL_OK")
</pallas_src>

<mosaic_0001>
module attributes {stable_mosaic.version = 11 : i64} {
  func.func @_gs_fused_kernel(%arg0: i32, %arg1: memref<16x128xf32, #tpu.memory_space<vmem>>, %arg2: memref<128x1024xf32, #tpu.memory_space<vmem>>, %arg3: memref<1x1024xf32, #tpu.memory_space<vmem>>, %arg4: memref<4x256x256xf32, #tpu.memory_space<vmem>>, %arg5: memref<4x1x256xf32, #tpu.memory_space<vmem>>, %arg6: memref<1024x128xf32, #tpu.memory_space<vmem>>, %arg7: memref<1x128xf32, #tpu.memory_space<vmem>>, %arg8: memref<16x128xf32, #tpu.memory_space<vmem>>) attributes {dimension_semantics = [#tpu.dimension_semantics<parallel>], iteration_bounds = array<i64: 1>, scalar_prefetch = 0 : i64, scratch_operands = 0 : i64, tpu.core_type = #tpu.core_type<tc>, window_params = [{transform_indices = @transform_0, window_bounds = array<i64: 16, 128>}, {pipeline_mode = #tpu.pipeline_mode<synchronous>, transform_indices = @transform_1, window_bounds = array<i64: 128, 1024>}, {pipeline_mode = #tpu.pipeline_mode<synchronous>, transform_indices = @transform_2, window_bounds = array<i64: 1, 1024>}, {pipeline_mode = #tpu.pipeline_mode<synchronous>, transform_indices = @transform_3, window_bounds = array<i64: 4, 256, 256>}, {pipeline_mode = #tpu.pipeline_mode<synchronous>, transform_indices = @transform_4, window_bounds = array<i64: 4, 1, 256>}, {pipeline_mode = #tpu.pipeline_mode<synchronous>, transform_indices = @transform_5, window_bounds = array<i64: 1024, 128>}, {pipeline_mode = #tpu.pipeline_mode<synchronous>, transform_indices = @transform_6, window_bounds = array<i64: 1, 128>}, {transform_indices = @transform_7, window_bounds = array<i64: 16, 128>}]} {
    %c0 = arith.constant 0 : index
    %c0_0 = arith.constant 0 : index
    %0 = vector.load %arg2[%c0, %c0_0] : memref<128x1024xf32, #tpu.memory_space<vmem>>, vector<128x1024xf32>
    %c0_1 = arith.constant 0 : index
    %c0_2 = arith.constant 0 : index
    %1 = vector.load %arg1[%c0_1, %c0_2] : memref<16x128xf32, #tpu.memory_space<vmem>>, vector<16x128xf32>
    %cst = arith.constant dense<0.000000e+00> : vector<16x1024xf32>
    %2 = tpu.matmul %1, %0, %cst {dimension_numbers = #tpu.dot_dimension_numbers<[1], [0], [0], [1], [0, 0, 1, 1], [], []>} : vector<16x128xf32>, vector<128x1024xf32>, vector<16x1024xf32> -> vector<16x1024xf32>
    %c0_3 = arith.constant 0 : index
    %c0_4 = arith.constant 0 : index
    %3 = vector.load %arg3[%c0_3, %c0_4] : memref<1x1024xf32, #tpu.memory_space<vmem>>, vector<1x1024xf32>
    %4 = vector.broadcast %3 : vector<1x1024xf32> to vector<16x1024xf32>
    %5 = arith.addf %2, %4 : vector<16x1024xf32>
    %cst_5 = arith.constant 0.000000e+00 : f32
    %6 = vector.broadcast %cst_5 : f32 to vector<16x1024xf32>
    %7 = arith.maximumf %5, %6 : vector<16x1024xf32>
    %8 = vector.extract_strided_slice %7 {offsets = [0, 0], sizes = [16, 256], strides = [1, 1]} : vector<16x1024xf32> to vector<16x256xf32>
    %c0_6 = arith.constant 0 : index
    %c0_7 = arith.constant 0 : index
    %c0_8 = arith.constant 0 : index
    %9 = vector.load %arg4[%c0_6, %c0_7, %c0_8] : memref<4x256x256xf32, #tpu.memory_space<vmem>>, vector<1x256x256xf32>
    %10 = vector.shape_cast %9 : vector<1x256x256xf32> to vector<256x256xf32>
    %cst_9 = arith.constant dense<0.000000e+00> : vector<16x256xf32>
    %11 = tpu.matmul %8, %10, %cst_9 {dimension_numbers = #tpu.dot_dimension_numbers<[1], [0], [0], [1], [0, 0, 1, 1], [], []>} : vector<16x256xf32>, vector<256x256xf32>, vector<16x256xf32> -> vector<16x256xf32>
    %c0_10 = arith.constant 0 : index
    %c0_11 = arith.constant 0 : index
    %c0_12 = arith.constant 0 : index
    %12 = vector.load %arg5[%c0_10, %c0_11, %c0_12] : memref<4x1x256xf32, #tpu.memory_space<vmem>>, vector<1x1x256xf32>
    %13 = vector.shape_cast %12 : vector<1x1x256xf32> to vector<1x256xf32>
    %14 = vector.broadcast %13 : vector<1x256xf32> to vector<16x256xf32>
    %15 = arith.addf %11, %14 : vector<16x256xf32>
    %cst_13 = arith.constant 0.000000e+00 : f32
    %16 = vector.broadcast %cst_13 : f32 to vector<16x256xf32>
    %17 = arith.maximumf %15, %16 : vector<16x256xf32>
    %18 = vector.extract_strided_slice %7 {offsets = [0, 256], sizes = [16, 256], strides = [1, 1]} : vector<16x1024xf32> to vector<16x256xf32>
    %c1 = arith.constant 1 : index
    %c0_14 = arith.constant 0 : index
    %c0_15 = arith.constant 0 : index
    %19 = vector.load %arg4[%c1, %c0_14, %c0_15] : memref<4x256x256xf32, #tpu.memory_space<vmem>>, vector<1x256x256xf32>
    %20 = vector.shape_cast %19 : vector<1x256x256xf32> to vector<256x256xf32>
    %cst_16 = arith.constant dense<0.000000e+00> : vector<16x256xf32>
    %21 = tpu.matmul %18, %20, %cst_16 {dimension_numbers = #tpu.dot_dimension_numbers<[1], [0], [0], [1], [0, 0, 1, 1], [], []>} : vector<16x256xf32>, vector<256x256xf32>, vector<16x256xf32> -> vector<16x256xf32>
    %c1_17 = arith.constant 1 : index
    %c0_18 = arith.constant 0 : index
    %c0_19 = arith.constant 0 : index
    %22 = vector.load %arg5[%c1_17, %c0_18, %c0_19] : memref<4x1x256xf32, #tpu.memory_space<vmem>>, vector<1x1x256xf32>
    %23 = vector.shape_cast %22 : vector<1x1x256xf32> to vector<1x256xf32>
    %24 = vector.broadcast %23 : vector<1x256xf32> to vector<16x256xf32>
    %25 = arith.addf %21, %24 : vector<16x256xf32>
    %cst_20 = arith.constant 0.000000e+00 : f32
    %26 = vector.broadcast %cst_20 : f32 to vector<16x256xf32>
    %27 = arith.maximumf %25, %26 : vector<16x256xf32>
    %28 = vector.extract_strided_slice %7 {offsets = [0, 512], sizes = [16, 256], strides = [1, 1]} : vector<16x1024xf32> to vector<16x256xf32>
    %c2 = arith.constant 2 : index
    %c0_21 = arith.constant 0 : index
    %c0_22 = arith.constant 0 : index
    %29 = vector.load %arg4[%c2, %c0_21, %c0_22] : memref<4x256x256xf32, #tpu.memory_space<vmem>>, vector<1x256x256xf32>
    %30 = vector.shape_cast %29 : vector<1x256x256xf32> to vector<256x256xf32>
    %cst_23 = arith.constant dense<0.000000e+00> : vector<16x256xf32>
    %31 = tpu.matmul %28, %30, %cst_23 {dimension_numbers = #tpu.dot_dimension_numbers<[1], [0], [0], [1], [0, 0, 1, 1], [], []>} : vector<16x256xf32>, vector<256x256xf32>, vector<16x256xf32> -> vector<16x256xf32>
    %c2_24 = arith.constant 2 : index
    %c0_25 = arith.constant 0 : index
    %c0_26 = arith.constant 0 : index
    %32 = vector.load %arg5[%c2_24, %c0_25, %c0_26] : memref<4x1x256xf32, #tpu.memory_space<vmem>>, vector<1x1x256xf32>
    %33 = vector.shape_cast %32 : vector<1x1x256xf32> to vector<1x256xf32>
    %34 = vector.broadcast %33 : vector<1x256xf32> to vector<16x256xf32>
    %35 = arith.addf %31, %34 : vector<16x256xf32>
    %cst_27 = arith.constant 0.000000e+00 : f32
    %36 = vector.broadcast %cst_27 : f32 to vector<16x256xf32>
    %37 = arith.maximumf %35, %36 : vector<16x256xf32>
    %38 = vector.extract_strided_slice %7 {offsets = [0, 768], sizes = [16, 256], strides = [1, 1]} : vector<16x1024xf32> to vector<16x256xf32>
    %c3 = arith.constant 3 : index
    %c0_28 = arith.constant 0 : index
    %c0_29 = arith.constant 0 : index
    %39 = vector.load %arg4[%c3, %c0_28, %c0_29] : memref<4x256x256xf32, #tpu.memory_space<vmem>>, vector<1x256x256xf32>
    %40 = vector.shape_cast %39 : vector<1x256x256xf32> to vector<256x256xf32>
    %cst_30 = arith.constant dense<0.000000e+00> : vector<16x256xf32>
    %41 = tpu.matmul %38, %40, %cst_30 {dimension_numbers = #tpu.dot_dimension_numbers<[1], [0], [0], [1], [0, 0, 1, 1], [], []>} : vector<16x256xf32>, vector<256x256xf32>, vector<16x256xf32> -> vector<16x256xf32>
    %c3_31 = arith.constant 3 : index
    %c0_32 = arith.constant 0 : index
    %c0_33 = arith.constant 0 : index
    %42 = vector.load %arg5[%c3_31, %c0_32, %c0_33] : memref<4x1x256xf32, #tpu.memory_space<vmem>>, vector<1x1x256xf32>
    %43 = vector.shape_cast %42 : vector<1x1x256xf32> to vector<1x256xf32>
    %44 = vector.broadcast %43 : vector<1x256xf32> to vector<16x256xf32>
    %45 = arith.addf %41, %44 : vector<16x256xf32>
    %cst_34 = arith.constant 0.000000e+00 : f32
    %46 = vector.broadcast %cst_34 : f32 to vector<16x256xf32>
    %47 = arith.maximumf %45, %46 : vector<16x256xf32>
    %48 = tpu.concatenate %17, %27, %37, %47 in 1 : vector<16x256xf32>, vector<16x256xf32>, vector<16x256xf32>, vector<16x256xf32> -> vector<16x1024xf32>
    %c0_35 = arith.constant 0 : index
    %c0_36 = arith.constant 0 : index
    %49 = vector.load %arg6[%c0_35, %c0_36] : memref<1024x128xf32, #tpu.memory_space<vmem>>, vector<1024x128xf32>
    %cst_37 = arith.constant dense<0.000000e+00> : vector<16x128xf32>
    %50 = tpu.matmul %48, %49, %cst_37 {dimension_numbers = #tpu.dot_dimension_numbers<[1], [0], [0], [1], [0, 0, 1, 1], [], []>} : vector<16x1024xf32>, vector<1024x128xf32>, vector<16x128xf32> -> vector<16x128xf32>
    %c0_38 = arith.constant 0 : index
    %c0_39 = arith.constant 0 : index
    %51 = vector.load %arg7[%c0_38, %c0_39] : memref<1x128xf32, #tpu.memory_space<vmem>>, vector<1x128xf32>
    %52 = vector.broadcast %51 : vector<1x128xf32> to vector<16x128xf32>
    %53 = arith.addf %50, %52 : vector<16x128xf32>
    %54 = tpu.iota {dimensions = array<i32: 1>} : vector<1x128xi32>
    %c4_i32 = arith.constant 4 : i32
    %55 = vector.broadcast %c4_i32 : i32 to vector<1x128xi32>
    %56 = arith.cmpi slt, %54, %55 : vector<1x128xi32>
    %c7_i32 = arith.constant 7 : i32
    %57 = vector.broadcast %c7_i32 : i32 to vector<1x128xi32>
    %58 = arith.cmpi slt, %54, %57 : vector<1x128xi32>
    %59 = arith.mulf %53, %53 : vector<16x128xf32>
    %cst_40 = arith.constant 0.000000e+00 : f32
    %60 = vector.shape_cast %56 : vector<1x128xi1> to vector<1x128xi1>
    %61 = vector.broadcast %60 : vector<1x128xi1> to vector<16x128xi1>
    %62 = vector.broadcast %cst_40 : f32 to vector<16x128xf32>
    %63 = arith.select %61, %59, %62 : vector<16x128xi1>, vector<16x128xf32>
    %cst_41 = arith.constant dense<0.000000e+00> : vector<16xf32>
    %64 = vector.multi_reduction <add>, %63, %cst_41 [1] : vector<16x128xf32> to vector<16xf32>
    %65 = vector.shape_cast %64 : vector<16xf32> to vector<16x1xf32>
    %cst_42 = arith.constant 1.000000e-24 : f32
    %66 = vector.broadcast %cst_42 : f32 to vector<16x1xf32>
    %67 = arith.maximumf %65, %66 : vector<16x1xf32>
    %68 = math.rsqrt %67 : vector<16x1xf32>
    %69 = vector.broadcast %68 : vector<16x1xf32> to vector<16x128xf32>
    %70 = arith.mulf %53, %69 : vector<16x128xf32>
    %cst_43 = arith.constant 1.000000e+02 : f32
    %71 = vector.broadcast %cst_43 : f32 to vector<16x128xf32>
    %72 = arith.mulf %71, %53 : vector<16x128xf32>
    %cst_44 = arith.constant 2.000000e+01 : f32
    %73 = vector.broadcast %cst_44 : f32 to vector<16x128xf32>
    %74 = arith.cmpf ogt, %72, %73 : vector<16x128xf32>
    %cst_45 = arith.constant 2.000000e+01 : f32
    %75 = vector.broadcast %cst_45 : f32 to vector<16x128xf32>
    %76 = arith.minimumf %72, %75 : vector<16x128xf32>
    %77 = math.exp %76 : vector<16x128xf32>
    %78 = math.log1p %77 : vector<16x128xf32>
    %cst_46 = arith.constant 0.00999999977 : f32
    %79 = vector.broadcast %cst_46 : f32 to vector<16x128xf32>
    %80 = arith.mulf %78, %79 : vector<16x128xf32>
    %81 = arith.select %74, %53, %80 : vector<16x128xi1>, vector<16x128xf32>
    %cst_47 = arith.constant 5.000000e-01 : f32
    %82 = vector.broadcast %cst_47 : f32 to vector<16x128xf32>
    %83 = arith.mulf %82, %53 : vector<16x128xf32>
    %84 = math.tanh %83 : vector<16x128xf32>
    %cst_48 = arith.constant 1.000000e+00 : f32
    %85 = vector.broadcast %cst_48 : f32 to vector<16x128xf32>
    %86 = arith.addf %84, %85 : vector<16x128xf32>
    %cst_49 = arith.constant 5.000000e-01 : f32
    %87 = vector.broadcast %cst_49 : f32 to vector<16x128xf32>
    %88 = arith.mulf %87, %86 : vector<16x128xf32>
    %89 = vector.shape_cast %58 : vector<1x128xi1> to vector<1x128xi1>
    %90 = vector.broadcast %89 : vector<1x128xi1> to vector<16x128xi1>
    %91 = arith.select %90, %81, %88 : vector<16x128xi1>, vector<16x128xf32>
    %92 = vector.shape_cast %56 : vector<1x128xi1> to vector<1x128xi1>
    %93 = vector.broadcast %92 : vector<1x128xi1> to vector<16x128xi1>
    %94 = arith.select %93, %70, %91 : vector<16x128xi1>, vector<16x128xf32>
    %c0_50 = arith.constant 0 : index
    %c0_51 = arith.constant 0 : index
    %95 = vector.load %arg8[%c0_50, %c0_51] : memref<16x128xf32, #tpu.memory_space<vmem>>, vector<16x128xf32>
    tpu.vector_store %arg8[%c0_50, %c0_51], %94 {strides = array<i32>} : memref<16x128xf32, #tpu.memory_space<vmem>>, vector<16x128xf32>,
    return
  }
  func.func @transform_0(%arg0: i32) -> (i32, i32) {
    %c0_i32 = arith.constant 0 : i32
    %c0_i32_0 = arith.constant 0 : i32
    return %arg0, %c0_i32 : i32, i32
  }
  func.func @transform_1(%arg0: i32) -> (i32, i32) {
    %c0_i32 = arith.constant 0 : i32
    %c0_i32_0 = arith.constant 0 : i32
    %c0_i32_1 = arith.constant 0 : i32
    return %c0_i32, %c0_i32_0 : i32, i32
  }
  func.func @transform_2(%arg0: i32) -> (i32, i32) {
    %c0_i32 = arith.constant 0 : i32
    %c0_i32_0 = arith.constant 0 : i32
    %c0_i32_1 = arith.constant 0 : i32
    return %c0_i32, %c0_i32_0 : i32, i32
  }
  func.func @transform_3(%arg0: i32) -> (i32, i32, i32) {
    %c0_i32 = arith.constant 0 : i32
    %c0_i32_0 = arith.constant 0 : i32
    %c0_i32_1 = arith.constant 0 : i32
    %c0_i32_2 = arith.constant 0 : i32
    return %c0_i32, %c0_i32_0, %c0_i32_1 : i32, i32, i32
  }
  func.func @transform_4(%arg0: i32) -> (i32, i32, i32) {
    %c0_i32 = arith.constant 0 : i32
    %c0_i32_0 = arith.constant 0 : i32
    %c0_i32_1 = arith.constant 0 : i32
    %c0_i32_2 = arith.constant 0 : i32
    return %c0_i32, %c0_i32_0, %c0_i32_1 : i32, i32, i32
  }
  func.func @transform_5(%arg0: i32) -> (i32, i32) {
    %c0_i32 = arith.constant 0 : i32
    %c0_i32_0 = arith.constant 0 : i32
    %c0_i32_1 = arith.constant 0 : i32
    return %c0_i32, %c0_i32_0 : i32, i32
  }
  func.func @transform_6(%arg0: i32) -> (i32, i32) {
    %c0_i32 = arith.constant 0 : i32
    %c0_i32_0 = arith.constant 0 : i32
    %c0_i32_1 = arith.constant 0 : i32
    return %c0_i32, %c0_i32_0 : i32, i32
  }
  func.func @transform_7(%arg0: i32) -> (i32, i32) {
    %c0_i32 = arith.constant 0 : i32
    %c0_i32_0 = arith.constant 0 : i32
    return %arg0, %c0_i32 : i32, i32
  }
}

</mosaic_0001>

<bundles_post_ra>
// kernel: gs_regresser_forward.1
= control target key start
LH: loop header
LB: loop body
LE: loop exit
PB: predicated region body
PF: predicated region fallthrough
CT: control target
= control target key end

     0   :  { %12 = vsyncpa [#allocation3], 0  ;;  %s1888_s0 = inlined_call_operand.hbm [shape: f32[16,128], index: 0, kind: input, shape index: {}]   ;;  %s1889_s1 = inlined_call_operand.hbm [shape: f32[128,1024], index: 1, kind: input, shape index: {}]   ;;  %s1890_s2 = inlined_call_operand.hbm [shape: f32[1,1024], index: 2, kind: input, shape index: {}]   ;;  %s1891_s3 = inlined_call_operand.hbm [shape: f32[4,256,256], index: 3, kind: input, shape index: {}]   ;;  %s1892_s4 = inlined_call_operand.hbm [shape: f32[4,1,256], index: 4, kind: input, shape index: {}]   ;;  %s1893_s5 = inlined_call_operand.hbm [shape: f32[1024,128], index: 5, kind: input, shape index: {}]   ;;  %s1894_s6 = inlined_call_operand.vmem [shape: f32[1,128], index: 6, kind: input, shape index: {}]   ;;  %s1895_s7 = inlined_call_operand.vmem [shape: f32[16,128], index: 7, kind: output, shape index: {}]  }
   0x1   :  { %13 = vsyncpa [#allocation5], 0 }
   0x2   :  { %14 = vsyncpa [#allocation8], 0  ;;  %s33_s26 = sshll.u32 %s1889_s1, 4  ;;  %s34_s26 = int_to_ptr.hbm [resolvable:$true] %s33_s26 }
   0x3   :  { %15 = vsyncpa [#allocation11], 0  ;;  %s1729_s27 = smov [#allocation4]   ;;  %s57_s8 = sshll.u32 %s1891_s3, 4  ;;  %s58_s8 = int_to_ptr.hbm [resolvable:$true] %s57_s8 }
   0x4   :  { %s35_s28 = sshll.u32 %s1729_s27, 4  ;;  %s1730_s9 = smov 1024   ;;  %s36_s28 = int_to_ptr.vmem [resolvable:$true] %s35_s28 }
   0x5   :  { %s1731_s10 = smov 64   ;;  %s1732_s11 = smov [#allocation7]  }
   0x6   :  { %41 = dma.hbm_to_vmem [thread:$0]  %s34_s26, 16384, %s36_s28, [#allocation5], %s1730_s9, %s1730_s9, %s1731_s10  }
   0x7   :  { %s59_s12 = sshll.u32 %s1732_s11, 4  ;;  %s1733_s13 = smov 256   ;;  %s60_s12 = int_to_ptr.vmem [resolvable:$true] %s59_s12 }
   0x8   :  { %s1734_s14 = smov 16   ;;  %s20_s16 = sshll.u32 %s1888_s0, 4  ;;  %s21_s16 = int_to_ptr.hbm [resolvable:$true] %s20_s16 }
   0x9   :  { %65 = dma.hbm_to_vmem [thread:$0]  %s58_s8, 32768, %s60_s12, [#allocation8], %s1733_s13, %s1733_s13, %s1734_s14  }
   0xa   :  { %s1735_s17 = smov [#allocation2]   ;;  %s47_s20 = sshll.u32 %s1890_s2, 4  ;;  %s48_s20 = int_to_ptr.hbm [resolvable:$true] %s47_s20 }
   0xb   :  { %s22_s18 = sshll.u32 %s1735_s17, 4  ;;  %s1736_s21 = smov 128   ;;  %s23_s18 = int_to_ptr.vmem [resolvable:$true] %s22_s18 }
   0xc   :  { %s1737_s22 = smov 8   ;;  %s1738_s23 = smov [#allocation6]  }
   0xd   :  { %28 = dma.hbm_to_vmem [thread:$0]  %s21_s16, 256, %s23_s18, [#allocation3], %s1736_s21, %s1736_s21, %s1737_s22  }
   0xe   :  { %s49_s24 = sshll.u32 %s1738_s23, 4  ;;  %s70_s27 = sshll.u32 %s1892_s4, 4  ;;  %s50_s24 = int_to_ptr.vmem [resolvable:$true] %s49_s24  ;;  %s71_s27 = int_to_ptr.hbm [resolvable:$true] %s70_s27 }
   0xf   :  { %52 = dma.hbm_to_vmem [thread:$0]  %s48_s20, 128, %s50_s24, [#allocation5]  }
  0x10   :  { %s1739_s0 = smov [#allocation9]   ;;  %s83_s2 = sshll.u32 %s1893_s5, 4  ;;  %s84_s2 = int_to_ptr.hbm [resolvable:$true] %s83_s2 }
  0x11   :  { %s72_s28 = sshll.u32 %s1739_s0, 4  ;;  %s1740_s8 = smov 32   ;;  %s73_s28 = int_to_ptr.vmem [resolvable:$true] %s72_s28 }
  0x12   :  { %s1741_s9 = smov 2   ;;  %s1742_s10 = smov [#allocation10]  }
  0x13   :  { %78 = dma.hbm_to_vmem [thread:$0]  %s71_s27, 128, %s73_s28, [#allocation8], %s1740_s8, %s1740_s8, %s1741_s9  }
  0x14   :  { %s85_s11 = sshll.u32 %s1742_s10, 4  ;;  %s86_s11 = int_to_ptr.vmem [resolvable:$true] %s85_s11 }
  0x15   :  { %91 = dma.hbm_to_vmem [thread:$0]  %s84_s2, 16384, %s86_s11, [#allocation11], %s1736_s21, %s1736_s21, %s1737_s22  }
  0x16   :  { %1721 = dma.done.wait [#allocation3], 256  }
  0x17   :  { %1722 = vsyncadd [#allocation3], 4294967040 }
  0x18   :  { %1723 = dma.done.wait [#allocation5], 16512  }
  0x19   :  { %1724 = vsyncadd [#allocation5], 4294950784 }
  0x1a   :  { %1725 = dma.done.wait [#allocation8], 32896  }
  0x1b   :  { %1726 = vsyncadd [#allocation8], 4294934400 }
  0x1c   :  { %1727 = dma.done.wait [#allocation11], 16384  }
  0x1d   :  { %1728 = vsyncadd [#allocation11], 4294950912  ;;  %v238_v0 = vld [vmem:[#allocation4 + $0x3c0] sm:$0xff]  ;;  %v239_v2 = vld [vmem:[#allocation4 + $0x3c8] sm:$0xff] }
  0x1e   :  { %v230_v1 = vld [vmem:[#allocation4 + $0x380] sm:$0xff]  ;;  %266 = vmatpush.msra.mxu0 %v238_v0  ;;  %289 = vmatpush.msra.mxu1 %v239_v2  ;;  %v231_v3 = vld [vmem:[#allocation4 + $0x388] sm:$0xff]  ;;  %v240_v6 = vld [vmem:[#allocation4 + $0x3d0] sm:$0xff] }
  0x1f   :  { %v222_v4 = vld [vmem:[#allocation4 + $0x340] sm:$0xff]  ;;  %v223_v5 = vld [vmem:[#allocation4 + $0x348] sm:$0xff]  ;;  %312 = vmatpush.msra.mxu2 %v240_v6  ;;  %v232_v9 = vld [vmem:[#allocation4 + $0x390] sm:$0xff] }
  0x20   :  { %267 = vmatpush.msra.mxu0 %v230_v1  ;;  %290 = vmatpush.msra.mxu1 %v231_v3  ;;  %v214_v7 = vld [vmem:[#allocation4 + $0x300] sm:$0xff]  ;;  %v215_v8 = vld [vmem:[#allocation4 + $0x308] sm:$0xff]  ;;  %v241_v11 = vld [vmem:[#allocation4 + $0x3d8] sm:$0xff] }
  0x21   :  { %v206_v10 = vld [vmem:[#allocation4 + $0x2c0] sm:$0xff]  ;;  %v207_v12 = vld [vmem:[#allocation4 + $0x2c8] sm:$0xff]  ;;  %313 = vmatpush.msra.mxu2 %v232_v9  ;;  %335 = vmatpush.msra.mxu3 %v241_v11  ;;  %v224_v13 = vld [vmem:[#allocation4 + $0x350] sm:$0xff] }
  0x22   :  { %268 = vmatpush.msra.mxu0 %v222_v4  ;;  %291 = vmatpush.msra.mxu1 %v223_v5  ;;  %v233_v14 = vld [vmem:[#allocation4 + $0x398] sm:$0xff]  ;;  %v216_v15 = vld [vmem:[#allocation4 + $0x310] sm:$0xff]  ;;  %v198_v17 = vld [vmem:[#allocation4 + $0x280] sm:$0xff] }
  0x23   :  { %v225_v16 = vld [vmem:[#allocation4 + $0x358] sm:$0xff]  ;;  %v199_v18 = vld [vmem:[#allocation4 + $0x288] sm:$0xff]  ;;  %314 = vmatpush.msra.mxu2 %v224_v13  ;;  %336 = vmatpush.msra.mxu3 %v233_v14  ;;  %v208_v19 = vld [vmem:[#allocation4 + $0x2d0] sm:$0xff] }
  0x24   :  { %269 = vmatpush.msra.mxu0 %v214_v7  ;;  %292 = vmatpush.msra.mxu1 %v215_v8  ;;  %v217_v20 = vld [vmem:[#allocation4 + $0x318] sm:$0xff]  ;;  %v190_v21 = vld [vmem:[#allocation4 + $0x240] sm:$0xff]  ;;  %v191_v22 = vld [vmem:[#allocation4 + $0x248] sm:$0xff] }
  0x25   :  { %315 = vmatpush.msra.mxu2 %v216_v15  ;;  %337 = vmatpush.msra.mxu3 %v225_v16  ;;  %v200_v23 = vld [vmem:[#allocation4 + $0x290] sm:$0xff]  ;;  %v209_v24 = vld [vmem:[#allocation4 + $0x2d8] sm:$0xff]  ;;  %v182_v25 = vld [vmem:[#allocation4 + $0x200] sm:$0xff] }
  0x26   :  { %270 = vmatpush.msra.mxu0 %v206_v10  ;;  %293 = vmatpush.msra.mxu1 %v207_v12  ;;  %v183_v26 = vld [vmem:[#allocation4 + $0x208] sm:$0xff]  ;;  %v192_v27 = vld [vmem:[#allocation4 + $0x250] sm:$0xff]  ;;  %v201_v28 = vld [vmem:[#allocation4 + $0x298] sm:$0xff] }
  0x27   :  { %316 = vmatpush.msra.mxu2 %v208_v19  ;;  %338 = vmatpush.msra.mxu3 %v217_v20  ;;  %v174_v29 = vld [vmem:[#allocation4 + $0x1c0] sm:$0xff]  ;;  %v175_v30 = vld [vmem:[#allocation4 + $0x1c8] sm:$0xff]  ;;  %v184_v31 = vld [vmem:[#allocation4 + $0x210] sm:$0xff] }
  0x28   :  { %271 = vmatpush.msra.mxu0 %v198_v17  ;;  %294 = vmatpush.msra.mxu1 %v199_v18  ;;  %v193_v32 = vld [vmem:[#allocation4 + $0x258] sm:$0xff]  ;;  %v166_v33 = vld [vmem:[#allocation4 + $0x180] sm:$0xff]  ;;  %v167_v34 = vld [vmem:[#allocation4 + $0x188] sm:$0xff] }
  0x29   :  { %317 = vmatpush.msra.mxu2 %v200_v23  ;;  %339 = vmatpush.msra.mxu3 %v209_v24  ;;  %v176_v35 = vld [vmem:[#allocation4 + $0x1d0] sm:$0xff]  ;;  %v185_v36 = vld [vmem:[#allocation4 + $0x218] sm:$0xff]  ;;  %v158_v37 = vld [vmem:[#allocation4 + $0x140] sm:$0xff] }
  0x2a   :  { %272 = vmatpush.msra.mxu0 %v190_v21  ;;  %295 = vmatpush.msra.mxu1 %v191_v22  ;;  %v159_v38 = vld [vmem:[#allocation4 + $0x148] sm:$0xff]  ;;  %v168_v39 = vld [vmem:[#allocation4 + $0x190] sm:$0xff]  ;;  %v177_v40 = vld [vmem:[#allocation4 + $0x1d8] sm:$0xff] }
  0x2b   :  { %318 = vmatpush.msra.mxu2 %v192_v27  ;;  %340 = vmatpush.msra.mxu3 %v201_v28  ;;  %v150_v41 = vld [vmem:[#allocation4 + $0x100] sm:$0xff]  ;;  %v151_v42 = vld [vmem:[#allocation4 + $0x108] sm:$0xff]  ;;  %v160_v43 = vld [vmem:[#allocation4 + $0x150] sm:$0xff] }
  0x2c   :  { %273 = vmatpush.msra.mxu0 %v182_v25  ;;  %296 = vmatpush.msra.mxu1 %v183_v26  ;;  %v169_v44 = vld [vmem:[#allocation4 + $0x198] sm:$0xff]  ;;  %v142_v45 = vld [vmem:[#allocation4 + $0xc0] sm:$0xff]  ;;  %v143_v46 = vld [vmem:[#allocation4 + $0xc8] sm:$0xff] }
  0x2d   :  { %319 = vmatpush.msra.mxu2 %v184_v31  ;;  %341 = vmatpush.msra.mxu3 %v193_v32  ;;  %v152_v47 = vld [vmem:[#allocation4 + $0x110] sm:$0xff]  ;;  %v161_v48 = vld [vmem:[#allocation4 + $0x158] sm:$0xff]  ;;  %v134_v49 = vld [vmem:[#allocation4 + $0x80] sm:$0xff] }
  0x2e   :  { %274 = vmatpush.msra.mxu0 %v174_v29  ;;  %297 = vmatpush.msra.mxu1 %v175_v30  ;;  %v135_v50 = vld [vmem:[#allocation4 + $0x88] sm:$0xff]  ;;  %v144_v51 = vld [vmem:[#allocation4 + $0xd0] sm:$0xff]  ;;  %v153_v52 = vld [vmem:[#allocation4 + $0x118] sm:$0xff] }
  0x2f   :  { %320 = vmatpush.msra.mxu2 %v176_v35  ;;  %342 = vmatpush.msra.mxu3 %v185_v36  ;;  %v126_v53 = vld [vmem:[#allocation4 + $0x40] sm:$0xff]  ;;  %v127_v54 = vld [vmem:[#allocation4 + $0x48] sm:$0xff]  ;;  %v136_v55 = vld [vmem:[#allocation4 + $0x90] sm:$0xff] }
  0x30   :  { %275 = vmatpush.msra.mxu0 %v166_v33  ;;  %298 = vmatpush.msra.mxu1 %v167_v34  ;;  %v145_v56 = vld [vmem:[#allocation4 + $0xd8] sm:$0xff]  ;;  %v118_v57 = vld [vmem:[#allocation4] sm:$0xff]  ;;  %v119_v58 = vld [vmem:[#allocation4 + $0x8] sm:$0xff] }
  0x31   :  { %321 = vmatpush.msra.mxu2 %v168_v39  ;;  %343 = vmatpush.msra.mxu3 %v177_v40  ;;  %v1801_v59 = vld [vmem:[#allocation2] sm:$0xff]  ;;  %v242_v60 = vld [vmem:[#allocation4 + $0x3e0] sm:$0xff]  ;;  %v243_v61 = vld [vmem:[#allocation4 + $0x3e8] sm:$0xff] }
  0x32   :  { %276 = vmatpush.msra.mxu0 %v158_v37  ;;  %299 = vmatpush.msra.mxu1 %v159_v38  ;;  %v128_v62 = vld [vmem:[#allocation4 + $0x50] sm:$0xff]  ;;  %v137_v63 = vld [vmem:[#allocation4 + $0x98] sm:$0xff]  ;;  %v234_v0 = vld [vmem:[#allocation4 + $0x3a0] sm:$0xff] }
  0x33   :  { %322 = vmatpush.msra.mxu2 %v160_v43  ;;  %344 = vmatpush.msra.mxu3 %v169_v44  ;;  %v235_v1 = vld [vmem:[#allocation4 + $0x3a8] sm:$0xff]  ;;  %v120_v2 = vld [vmem:[#allocation4 + $0x10] sm:$0xff]  ;;  %v129_v3 = vld [vmem:[#allocation4 + $0x58] sm:$0xff] }
  0x34   :  { %277 = vmatpush.msra.mxu0 %v150_v41  ;;  %300 = vmatpush.msra.mxu1 %v151_v42  ;;  %v226_v4 = vld [vmem:[#allocation4 + $0x360] sm:$0xff]  ;;  %v227_v5 = vld [vmem:[#allocation4 + $0x368] sm:$0xff]  ;;  %v121_v6 = vld [vmem:[#allocation4 + $0x18] sm:$0xff] }
  0x35   :  { %323 = vmatpush.msra.mxu2 %v152_v47  ;;  %345 = vmatpush.msra.mxu3 %v161_v48  ;;  %v218_v7 = vld [vmem:[#allocation4 + $0x320] sm:$0xff]  ;;  %v219_v8 = vld [vmem:[#allocation4 + $0x328] sm:$0xff]  ;;  %v1805_v9 = vld [vmem:[#allocation2 + $0x8] sm:$0xff] }
  0x36   :  { %278 = vmatpush.msra.mxu0 %v142_v45  ;;  %301 = vmatpush.msra.mxu1 %v143_v46  ;;  %v210_v10 = vld [vmem:[#allocation4 + $0x2e0] sm:$0xff]  ;;  %v211_v11 = vld [vmem:[#allocation4 + $0x2e8] sm:$0xff]  ;;  %v244_v12 = vld [vmem:[#allocation4 + $0x3f0] sm:$0xff] }
  0x37   :  { %324 = vmatpush.msra.mxu2 %v144_v51  ;;  %346 = vmatpush.msra.mxu3 %v153_v52  ;;  %v202_v13 = vld [vmem:[#allocation4 + $0x2a0] sm:$0xff]  ;;  %v203_v14 = vld [vmem:[#allocation4 + $0x2a8] sm:$0xff]  ;;  %v236_v15 = vld [vmem:[#allocation4 + $0x3b0] sm:$0xff] }
  0x38   :  { %279 = vmatpush.msra.mxu0 %v134_v49  ;;  %302 = vmatpush.msra.mxu1 %v135_v50  ;;  %v245_v16 = vld [vmem:[#allocation4 + $0x3f8] sm:$0xff]  ;;  %v194_v17 = vld [vmem:[#allocation4 + $0x260] sm:$0xff]  ;;  %v195_v18 = vld [vmem:[#allocation4 + $0x268] sm:$0xff] }
  0x39   :  { %325 = vmatpush.msra.mxu2 %v136_v55  ;;  %347 = vmatpush.msra.mxu3 %v145_v56  ;;  %v237_v19 = vld [vmem:[#allocation4 + $0x3b8] sm:$0xff]  ;;  %v186_v20 = vld [vmem:[#allocation4 + $0x220] sm:$0xff]  ;;  %v187_v21 = vld [vmem:[#allocation4 + $0x228] sm:$0xff] }
  0x3a   :  { %280 = vmatpush.msra.mxu0 %v126_v53  ;;  %303 = vmatpush.msra.mxu1 %v127_v54  ;;  %v228_v22 = vld [vmem:[#allocation4 + $0x370] sm:$0xff]  ;;  %v229_v23 = vld [vmem:[#allocation4 + $0x378] sm:$0xff]  ;;  %v178_v24 = vld [vmem:[#allocation4 + $0x1e0] sm:$0xff] }
  0x3b   :  { %326 = vmatpush.msra.mxu2 %v128_v62  ;;  %348 = vmatpush.msra.mxu3 %v137_v63  ;;  %v179_v25 = vld [vmem:[#allocation4 + $0x1e8] sm:$0xff]  ;;  %v220_v26 = vld [vmem:[#allocation4 + $0x330] sm:$0xff]  ;;  %v170_v27 = vld [vmem:[#allocation4 + $0x1a0] sm:$0xff] }
  0x3c   :  { %281 = vmatpush.msra.mxu0 %v118_v57  ;;  %304 = vmatpush.msra.mxu1 %v119_v58  ;;  %v171_v28 = vld [vmem:[#allocation4 + $0x1a8] sm:$0xff]  ;;  %v212_v29 = vld [vmem:[#allocation4 + $0x2f0] sm:$0xff]  ;;  %v221_v30 = vld [vmem:[#allocation4 + $0x338] sm:$0xff] }
  0x3d   :  { %282 = vmatmul.f32.vlgmr.msra.gmra.mxu0 %v1801_v59  ;;  %305 = vmatmul.f32.vlgmr.msra.gmra.mxu1 %v1801_v59  ;;  %v162_v31 = vld [vmem:[#allocation4 + $0x160] sm:$0xff]  ;;  %v163_v32 = vld [vmem:[#allocation4 + $0x168] sm:$0xff]  ;;  %v204_v33 = vld [vmem:[#allocation4 + $0x2b0] sm:$0xff] }
  0x3e   :  { %358 = vmatpush.msrb.mxu0 %v242_v60  ;;  %381 = vmatpush.msrb.mxu1 %v243_v61  ;;  %v213_v34 = vld [vmem:[#allocation4 + $0x2f8] sm:$0xff]  ;;  %v154_v35 = vld [vmem:[#allocation4 + $0x120] sm:$0xff]  ;;  %v155_v36 = vld [vmem:[#allocation4 + $0x128] sm:$0xff] }
  0x3f   :  { %327 = vmatpush.msra.mxu2 %v120_v2  ;;  %349 = vmatpush.msra.mxu3 %v129_v3  ;;  %v196_v37 = vld [vmem:[#allocation4 + $0x270] sm:$0xff]  ;;  %v205_v38 = vld [vmem:[#allocation4 + $0x2b8] sm:$0xff]  ;;  %v146_v39 = vld [vmem:[#allocation4 + $0xe0] sm:$0xff] }
  0x40   :  { %359 = vmatpush.msrb.mxu0 %v234_v0  ;;  %382 = vmatpush.msrb.mxu1 %v235_v1  ;;  %v147_v40 = vld [vmem:[#allocation4 + $0xe8] sm:$0xff]  ;;  %v188_v41 = vld [vmem:[#allocation4 + $0x230] sm:$0xff]  ;;  %v197_v42 = vld [vmem:[#allocation4 + $0x278] sm:$0xff] }
  0x41   :  { %328 = vmatmul.f32.vlgmr.msra.gmra.mxu2 %v1801_v59  ;;  %350 = vmatpush.msra.mxu3 %v121_v6  ;;  %v138_v43 = vld [vmem:[#allocation4 + $0xa0] sm:$0xff]  ;;  %v139_v44 = vld [vmem:[#allocation4 + $0xa8] sm:$0xff]  ;;  %v180_v45 = vld [vmem:[#allocation4 + $0x1f0] sm:$0xff] }
  0x42   :  { %360 = vmatpush.msrb.mxu0 %v226_v4  ;;  %383 = vmatpush.msrb.mxu1 %v227_v5  ;;  %v189_v46 = vld [vmem:[#allocation4 + $0x238] sm:$0xff]  ;;  %v130_v47 = vld [vmem:[#allocation4 + $0x60] sm:$0xff]  ;;  %v131_v48 = vld [vmem:[#allocation4 + $0x68] sm:$0xff] }
  0x43   :  { %351 = vmatmul.f32.vlgmr.msra.gmra.mxu3 %v1801_v59  ;;  %404 = vmatpush.msrb.mxu2 %v244_v12  ;;  %v172_v49 = vld [vmem:[#allocation4 + $0x1b0] sm:$0xff]  ;;  %v181_v50 = vld [vmem:[#allocation4 + $0x1f8] sm:$0xff]  ;;  %v122_v51 = vld [vmem:[#allocation4 + $0x20] sm:$0xff] }
  0x44   :  { %361 = vmatpush.msrb.mxu0 %v218_v7  ;;  %384 = vmatpush.msrb.mxu1 %v219_v8  ;;  %v123_v52 = vld [vmem:[#allocation4 + $0x28] sm:$0xff]  ;;  %v164_v53 = vld [vmem:[#allocation4 + $0x170] sm:$0xff]  ;;  %v173_v54 = vld [vmem:[#allocation4 + $0x1b8] sm:$0xff] }
  0x45   :  { %285 = vmatmul.f32.gmra.mxu0 %v1805_v9  ;;  %308 = vmatmul.f32.gmra.mxu1 %v1805_v9  ;;  %v496_v55 = vld [vmem:[#allocation7 + $0xf0] sm:$0xff]  ;;  %v156_v57 = vld [vmem:[#allocation4 + $0x130] sm:$0xff]  ;;  %v494_v60 = vld [vmem:[#allocation7 + $0xe0] sm:$0xff] }
  0x46   :  { %362 = vmatpush.msrb.mxu0 %v210_v10  ;;  %385 = vmatpush.msrb.mxu1 %v211_v11  ;;  %v528_v56 = vld [vmem:[#allocation7 + $0x1f0] sm:$0xff]  ;;  %v526_v61 = vld [vmem:[#allocation7 + $0x1e0] sm:$0xff]  ;;  %v148_v62 = vld [vmem:[#allocation4 + $0xf0] sm:$0xff] }
  0x47   :  { %405 = vmatpush.msrb.mxu2 %v236_v15  ;;  %427 = vmatpush.msrb.mxu3 %v245_v16  ;;  %v165_v58 = vld [vmem:[#allocation4 + $0x178] sm:$0xff]  ;;  %v140_v2 = vld [vmem:[#allocation4 + $0xb0] sm:$0xff]  ;;  %v490_v6 = vld [vmem:[#allocation7 + $0xc0] sm:$0xff] }
  0x48   :  { %363 = vmatpush.msrb.mxu0 %v202_v13  ;;  %386 = vmatpush.msrb.mxu1 %v203_v14  ;;  %v157_v63 = vld [vmem:[#allocation4 + $0x138] sm:$0xff]  ;;  %v132_v4 = vld [vmem:[#allocation4 + $0x70] sm:$0xff]  ;;  %v522_v7 = vld [vmem:[#allocation7 + $0x1c0] sm:$0xff] }
  0x49   :  { %331 = vmatmul.f32.gmra.mxu2 %v1805_v9  ;;  %428 = vmatpush.msrb.mxu3 %v237_v19  ;;  %v492_v0 = vld [vmem:[#allocation7 + $0xd0] sm:$0xff]  ;;  %v124_v8 = vld [vmem:[#allocation4 + $0x30] sm:$0xff]  ;;  %v497_v13 = vld [vmem:[#allocation7 + $0xf8] sm:$0xff] }
  0x4a   :  { %364 = vmatpush.msrb.mxu0 %v194_v17  ;;  %387 = vmatpush.msrb.mxu1 %v195_v18  ;;  %v524_v1 = vld [vmem:[#allocation7 + $0x1d0] sm:$0xff]  ;;  %v486_v14 = vld [vmem:[#allocation7 + $0xa0] sm:$0xff]  ;;  %v495_v15 = vld [vmem:[#allocation7 + $0xe8] sm:$0xff] }
  0x4b   :  { %406 = vmatpush.msrb.mxu2 %v228_v22  ;;  %429 = vmatpush.msrb.mxu3 %v229_v23  ;;  %v149_v3 = vld [vmem:[#allocation4 + $0xf8] sm:$0xff]  ;;  %v529_v16 = vld [vmem:[#allocation7 + $0x1f8] sm:$0xff]  ;;  %v482_v22 = vld [vmem:[#allocation7 + $0x80] sm:$0xff] }
  0x4c   :  { %365 = vmatpush.msrb.mxu0 %v186_v20  ;;  %388 = vmatpush.msrb.mxu1 %v187_v21  ;;  %v141_v5 = vld [vmem:[#allocation4 + $0xb8] sm:$0xff]  ;;  %v493_v19 = vld [vmem:[#allocation7 + $0xd8] sm:$0xff]  ;;  %v527_v20 = vld [vmem:[#allocation7 + $0x1e8] sm:$0xff] }
  0x4d   :  { %354 = vmatmul.f32.gmra.mxu3 %v1805_v9  ;;  %407 = vmatpush.msrb.mxu2 %v220_v26  ;;  %v133_v10 = vld [vmem:[#allocation4 + $0x78] sm:$0xff]  ;;  %v518_v21 = vld [vmem:[#allocation7 + $0x1a0] sm:$0xff]  ;;  %v491_v23 = vld [vmem:[#allocation7 + $0xc8] sm:$0xff] }
  0x4e   :  { %366 = vmatpush.msrb.mxu0 %v178_v24  ;;  %389 = vmatpush.msrb.mxu1 %v179_v25  ;;  %v488_v11 = vld [vmem:[#allocation7 + $0xb0] sm:$0xff]  ;;  %v525_v24 = vld [vmem:[#allocation7 + $0x1d8] sm:$0xff] }
  0x4f   :  { %408 = vmatpush.msrb.mxu2 %v212_v29  ;;  %430 = vmatpush.msrb.mxu3 %v221_v30  ;;  %v125_v12 = vld [vmem:[#allocation4 + $0x38] sm:$0xff]  ;;  %v489_v26 = vld [vmem:[#allocation7 + $0xb8] sm:$0xff]  ;;  %v514_v30 = vld [vmem:[#allocation7 + $0x180] sm:$0xff] }
  0x50   :  { %367 = vmatpush.msrb.mxu0 %v170_v27  ;;  %390 = vmatpush.msrb.mxu1 %v171_v28  ;;  %v520_v17 = vld [vmem:[#allocation7 + $0x1b0] sm:$0xff]  ;;  %v523_v27 = vld [vmem:[#allocation7 + $0x1c8] sm:$0xff]  ;;  %v521_v29 = vld [vmem:[#allocation7 + $0x1b8] sm:$0xff] }
  0x51   :  { %409 = vmatpush.msrb.mxu2 %v204_v33  ;;  %431 = vmatpush.msrb.mxu3 %v213_v34  ;;  %v484_v18 = vld [vmem:[#allocation7 + $0x90] sm:$0xff]  ;;  %v487_v28 = vld [vmem:[#allocation7 + $0xa8] sm:$0xff] }
  0x52   :  { %368 = vmatpush.msrb.mxu0 %v162_v31  ;;  %391 = vmatpush.msrb.mxu1 %v163_v32  ;;  %v516_v25 = vld [vmem:[#allocation7 + $0x190] sm:$0xff]  ;;  %v478_v31 = vld [vmem:[#allocation7 + $0x60] sm:$0xff]  ;;  %v485_v32 = vld [vmem:[#allocation7 + $0x98] sm:$0xff] }
  0x53   :  { %410 = vmatpush.msrb.mxu2 %v196_v37  ;;  %432 = vmatpush.msrb.mxu3 %v205_v38  ;;  %v519_v33 = vld [vmem:[#allocation7 + $0x1a8] sm:$0xff]  ;;  %v512_v34 = vld [vmem:[#allocation7 + $0x170] sm:$0xff]  ;;  %v517_v37 = vld [vmem:[#allocation7 + $0x198] sm:$0xff] }
  0x54   :  { %369 = vmatpush.msrb.mxu0 %v154_v35  ;;  %392 = vmatpush.msrb.mxu1 %v155_v36  ;;  %v476_v35 = vld [vmem:[#allocation7 + $0x50] sm:$0xff]  ;;  %v483_v36 = vld [vmem:[#allocation7 + $0x88] sm:$0xff]  ;;  %v510_v38 = vld [vmem:[#allocation7 + $0x160] sm:$0xff] }
  0x55   :  { %411 = vmatpush.msrb.mxu2 %v188_v41  ;;  %433 = vmatpush.msrb.mxu3 %v197_v42  ;;  %v515_v41 = vld [vmem:[#allocation7 + $0x188] sm:$0xff]  ;;  %v472_v42 = vld [vmem:[#allocation7 + $0x30] sm:$0xff] }
  0x56   :  { %370 = vmatpush.msrb.mxu0 %v146_v39  ;;  %393 = vmatpush.msrb.mxu1 %v147_v40  ;;  %v474_v39 = vld [vmem:[#allocation7 + $0x40] sm:$0xff]  ;;  %v481_v40 = vld [vmem:[#allocation7 + $0x78] sm:$0xff] }
  0x57   :  { %412 = vmatpush.msrb.mxu2 %v180_v45  ;;  %434 = vmatpush.msrb.mxu3 %v189_v46  ;;  %v506_v45 = vld [vmem:[#allocation7 + $0x140] sm:$0xff] }
  0x58   :  { %371 = vmatpush.msrb.mxu0 %v138_v43  ;;  %394 = vmatpush.msrb.mxu1 %v139_v44  ;;  %v479_v43 = vld [vmem:[#allocation7 + $0x68] sm:$0xff]  ;;  %v513_v44 = vld [vmem:[#allocation7 + $0x178] sm:$0xff]  ;;  %v470_v46 = vld [vmem:[#allocation7 + $0x20] sm:$0xff] }
  0x59   :  { %413 = vmatpush.msrb.mxu2 %v172_v49  ;;  %435 = vmatpush.msrb.mxu3 %v181_v50  ;;  %v504_v49 = vld [vmem:[#allocation7 + $0x130] sm:$0xff] }
  0x5a   :  { %372 = vmatpush.msrb.mxu0 %v130_v47  ;;  %395 = vmatpush.msrb.mxu1 %v131_v48  ;;  %v477_v47 = vld [vmem:[#allocation7 + $0x58] sm:$0xff]  ;;  %v511_v48 = vld [vmem:[#allocation7 + $0x168] sm:$0xff]  ;;  %v468_v50 = vld [vmem:[#allocation7 + $0x10] sm:$0xff] }
  0x5b   :  { %414 = vmatpush.msrb.mxu2 %v164_v53  ;;  %436 = vmatpush.msrb.mxu3 %v173_v54  ;;  %v502_v53 = vld [vmem:[#allocation7 + $0x120] sm:$0xff] }
  0x5c   :  { %373 = vmatpush.msrb.mxu0 %v122_v51  ;;  %396 = vmatpush.msrb.mxu1 %v123_v52  ;;  %v475_v51 = vld [vmem:[#allocation7 + $0x48] sm:$0xff]  ;;  %v509_v52 = vld [vmem:[#allocation7 + $0x158] sm:$0xff]  ;;  %v466_v54 = vld [vmem:[#allocation7] sm:$0xff] }
  0x5d   :  { %374 = vmatmul.f32.vlgmr.msrb.gmra.mxu0 %v1801_v59  ;;  %397 = vmatmul.f32.vlgmr.msrb.gmra.mxu1 %v1801_v59 }
  0x5e   :  { %536 = vmatpush.msra.mxu0 %v496_v55  ;;  %559 = vmatpush.msra.mxu1 %v528_v56  ;;  %v473_v55 = vld [vmem:[#allocation7 + $0x38] sm:$0xff]  ;;  %v507_v56 = vld [vmem:[#allocation7 + $0x148] sm:$0xff] }
  0x5f   :  { %415 = vmatpush.msrb.mxu2 %v156_v57  ;;  %437 = vmatpush.msrb.mxu3 %v165_v58  ;;  %v500_v57 = vld [vmem:[#allocation7 + $0x110] sm:$0xff] }
  0x60   :  { %537 = vmatpush.msra.mxu0 %v494_v60  ;;  %560 = vmatpush.msra.mxu1 %v526_v61  ;;  %v663_v58 = vld [vmem:[#allocation7 + $0x2f0] sm:$0xff]  ;;  %v471_v60 = vld [vmem:[#allocation7 + $0x28] sm:$0xff]  ;;  %v505_v61 = vld [vmem:[#allocation7 + $0x138] sm:$0xff] }
  0x61   :  { %416 = vmatpush.msrb.mxu2 %v148_v62  ;;  %438 = vmatpush.msrb.mxu3 %v157_v63  ;;  %v498_v62 = vld [vmem:[#allocation7 + $0x100] sm:$0xff] }
  0x62   :  { %538 = vmatpush.msra.mxu0 %v492_v0  ;;  %561 = vmatpush.msra.mxu1 %v524_v1  ;;  %v661_v63 = vld [vmem:[#allocation7 + $0x2e0] sm:$0xff]  ;;  %v469_v0 = vld [vmem:[#allocation7 + $0x18] sm:$0xff]  ;;  %v503_v1 = vld [vmem:[#allocation7 + $0x128] sm:$0xff] }
  0x63   :  { %417 = vmatpush.msrb.mxu2 %v140_v2  ;;  %439 = vmatpush.msrb.mxu3 %v149_v3  ;;  %v695_v2 = vld [vmem:[#allocation7 + $0x3f0] sm:$0xff] }
  0x64   :  { %539 = vmatpush.msra.mxu0 %v490_v6  ;;  %562 = vmatpush.msra.mxu1 %v522_v7  ;;  %v659_v3 = vld [vmem:[#allocation7 + $0x2d0] sm:$0xff]  ;;  %v664_v6 = vld [vmem:[#allocation7 + $0x2f8] sm:$0xff]  ;;  %v693_v7 = vld [vmem:[#allocation7 + $0x3e0] sm:$0xff] }
  0x65   :  { %377 = vmatmul.f32.gmra.mxu0 %v1805_v9  ;;  %400 = vmatmul.f32.gmra.mxu1 %v1805_v9 }
  0x66   :  { %418 = vmatpush.msrb.mxu2 %v132_v4  ;;  %440 = vmatpush.msrb.mxu3 %v141_v5  ;;  %v467_v4 = vld [vmem:[#allocation7 + $0x8] sm:$0xff]  ;;  %v501_v5 = vld [vmem:[#allocation7 + $0x118] sm:$0xff] }
  0x67   :  { %540 = vmatpush.msra.mxu0 %v488_v11  ;;  %563 = vmatpush.msra.mxu1 %v520_v17  ;;  %v662_v11 = vld [vmem:[#allocation7 + $0x2e8] sm:$0xff]  ;;  %v689_v17 = vld [vmem:[#allocation7 + $0x3c0] sm:$0xff] }
  0x68   :  { %419 = vmatpush.msrb.mxu2 %v124_v8  ;;  %441 = vmatpush.msrb.mxu3 %v133_v10  ;;  %v499_v8 = vld [vmem:[#allocation7 + $0x108] sm:$0xff]  ;;  %v657_v10 = vld [vmem:[#allocation7 + $0x2c0] sm:$0xff] }
  0x69   :  { %420 = vmatmul.f32.vlgmr.msrb.gmra.mxu2 %v1801_v59  ;;  %541 = vmatpush.msra.mxu0 %v486_v14  ;;  %v655_v14 = vld [vmem:[#allocation7 + $0x2b0] sm:$0xff] }
  0x6a   :  { %442 = vmatpush.msrb.mxu3 %v125_v12  ;;  %582 = vmatpush.msra.mxu2 %v497_v13  ;;  %v696_v12 = vld [vmem:[#allocation7 + $0x3f8] sm:$0xff]  ;;  %v691_v13 = vld [vmem:[#allocation7 + $0x3d0] sm:$0xff] }
  0x6b   :  { %443 = vmatmul.f32.vlgmr.msrb.gmra.mxu3 %v1801_v59  ;;  %542 = vmatpush.msra.mxu0 %v484_v18  ;;  %v480_v59 = vld [vmem:[#allocation7 + $0x70] sm:$0xff]  ;;  %v653_v18 = vld [vmem:[#allocation7 + $0x2a0] sm:$0xff] }
  0x6c   :  { %583 = vmatpush.msra.mxu2 %v495_v15  ;;  %605 = vmatpush.msra.mxu3 %v529_v16  ;;  %v660_v15 = vld [vmem:[#allocation7 + $0x2d8] sm:$0xff]  ;;  %v694_v16 = vld [vmem:[#allocation7 + $0x3e8] sm:$0xff] }
  0x6d   :  { %564 = vmatpush.msra.mxu1 %v518_v21  ;;  %543 = vmatpush.msra.mxu0 %v482_v22  ;;  %v687_v21 = vld [vmem:[#allocation7 + $0x3b0] sm:$0xff] }
  0x6e   :  { %584 = vmatpush.msra.mxu2 %v493_v19  ;;  %606 = vmatpush.msra.mxu3 %v527_v20  ;;  %v658_v19 = vld [vmem:[#allocation7 + $0x2c8] sm:$0xff]  ;;  %v692_v20 = vld [vmem:[#allocation7 + $0x3d8] sm:$0xff]  ;;  %v651_v22 = vld [vmem:[#allocation7 + $0x290] sm:$0xff] }
  0x6f   :  { %565 = vmatpush.msra.mxu1 %v516_v25  ;;  %544 = vmatpush.msra.mxu0 %v480_v59  ;;  %v685_v25 = vld [vmem:[#allocation7 + $0x3a0] sm:$0xff]  ;;  %v688_v59 = vld [vmem:[#allocation7 + $0x3b8] sm:$0xff] }
  0x70   :  { %585 = vmatpush.msra.mxu2 %v491_v23  ;;  %607 = vmatpush.msra.mxu3 %v525_v24  ;;  %v656_v23 = vld [vmem:[#allocation7 + $0x2b8] sm:$0xff]  ;;  %v690_v24 = vld [vmem:[#allocation7 + $0x3c8] sm:$0xff] }
  0x71   :  { %423 = vmatmul.f32.gmra.mxu2 %v1805_v9  ;;  %566 = vmatpush.msra.mxu1 %v514_v30  ;;  %v652_v30 = vld [vmem:[#allocation7 + $0x298] sm:$0xff] }
  0x72   :  { %586 = vmatpush.msra.mxu2 %v489_v26  ;;  %608 = vmatpush.msra.mxu3 %v523_v27  ;;  %v649_v26 = vld [vmem:[#allocation7 + $0x280] sm:$0xff]  ;;  %v654_v27 = vld [vmem:[#allocation7 + $0x2a8] sm:$0xff] }
  0x73   :  { %446 = vmatmul.f32.gmra.mxu3 %v1805_v9  ;;  %545 = vmatpush.msra.mxu0 %v478_v31  ;;  %v508_v9 = vld [vmem:[#allocation7 + $0x150] sm:$0xff]  ;;  %v686_v31 = vld [vmem:[#allocation7 + $0x3a8] sm:$0xff] }
  0x74   :  { %587 = vmatpush.msra.mxu2 %v487_v28  ;;  %609 = vmatpush.msra.mxu3 %v521_v29  ;;  %v683_v28 = vld [vmem:[#allocation7 + $0x390] sm:$0xff] }
  0x75   :  { %567 = vmatpush.msra.mxu1 %v512_v34  ;;  %546 = vmatpush.msra.mxu0 %v476_v35  ;;  %v647_v29 = vld [vmem:[#allocation7 + $0x270] sm:$0xff]  ;;  %v650_v34 = vld [vmem:[#allocation7 + $0x288] sm:$0xff]  ;;  %v684_v35 = vld [vmem:[#allocation7 + $0x398] sm:$0xff] }
  0x76   :  { %588 = vmatpush.msra.mxu2 %v485_v32  ;;  %610 = vmatpush.msra.mxu3 %v519_v33  ;;  %v681_v32 = vld [vmem:[#allocation7 + $0x380] sm:$0xff] }
  0x77   :  { %568 = vmatpush.msra.mxu1 %v510_v38  ;;  %547 = vmatpush.msra.mxu0 %v474_v39  ;;  %v645_v33 = vld [vmem:[#allocation7 + $0x260] sm:$0xff]  ;;  %v648_v38 = vld [vmem:[#allocation7 + $0x278] sm:$0xff]  ;;  %v682_v39 = vld [vmem:[#allocation7 + $0x388] sm:$0xff] }
  0x78   :  { %589 = vmatpush.msra.mxu2 %v483_v36  ;;  %611 = vmatpush.msra.mxu3 %v517_v37  ;;  %v679_v36 = vld [vmem:[#allocation7 + $0x370] sm:$0xff] }
  0x79   :  { %569 = vmatpush.msra.mxu1 %v508_v9  ;;  %548 = vmatpush.msra.mxu0 %v472_v42  ;;  %v643_v37 = vld [vmem:[#allocation7 + $0x250] sm:$0xff]  ;;  %v646_v9 = vld [vmem:[#allocation7 + $0x268] sm:$0xff]  ;;  %v680_v42 = vld [vmem:[#allocation7 + $0x378] sm:$0xff] }
  0x7a   :  { %590 = vmatpush.msra.mxu2 %v481_v40  ;;  %612 = vmatpush.msra.mxu3 %v515_v41  ;;  %v677_v40 = vld [vmem:[#allocation7 + $0x360] sm:$0xff] }
  0x7b   :  { %570 = vmatpush.msra.mxu1 %v506_v45  ;;  %549 = vmatpush.msra.mxu0 %v470_v46  ;;  %v641_v41 = vld [vmem:[#allocation7 + $0x240] sm:$0xff]  ;;  %v644_v45 = vld [vmem:[#allocation7 + $0x258] sm:$0xff]  ;;  %v678_v46 = vld [vmem:[#allocation7 + $0x368] sm:$0xff] }
  0x7c   :  { %591 = vmatpush.msra.mxu2 %v479_v43  ;;  %613 = vmatpush.msra.mxu3 %v513_v44  ;;  %v675_v43 = vld [vmem:[#allocation7 + $0x350] sm:$0xff] }
  0x7d   :  { %571 = vmatpush.msra.mxu1 %v504_v49  ;;  %550 = vmatpush.msra.mxu0 %v468_v50  ;;  %v639_v44 = vld [vmem:[#allocation7 + $0x230] sm:$0xff]  ;;  %v642_v49 = vld [vmem:[#allocation7 + $0x248] sm:$0xff]  ;;  %v676_v50 = vld [vmem:[#allocation7 + $0x358] sm:$0xff] }
  0x7e   :  { %592 = vmatpush.msra.mxu2 %v477_v47  ;;  %614 = vmatpush.msra.mxu3 %v511_v48  ;;  %v673_v47 = vld [vmem:[#allocation7 + $0x340] sm:$0xff] }
  0x7f   :  { %572 = vmatpush.msra.mxu1 %v502_v53  ;;  %551 = vmatpush.msra.mxu0 %v466_v54  ;;  %v637_v48 = vld [vmem:[#allocation7 + $0x220] sm:$0xff]  ;;  %v640_v53 = vld [vmem:[#allocation7 + $0x238] sm:$0xff]  ;;  %v674_v54 = vld [vmem:[#allocation7 + $0x348] sm:$0xff] }
  0x80   :  { %593 = vmatpush.msra.mxu2 %v475_v51  ;;  %615 = vmatpush.msra.mxu3 %v509_v52  ;;  %v671_v51 = vld [vmem:[#allocation7 + $0x330] sm:$0xff] }
  0x81   :  { %573 = vmatpush.msra.mxu1 %v500_v57  ;;  %704 = vmatpush.msrb.mxu0 %v663_v58  ;;  %v635_v52 = vld [vmem:[#allocation7 + $0x210] sm:$0xff]  ;;  %v638_v57 = vld [vmem:[#allocation7 + $0x228] sm:$0xff]  ;;  %v672_v58 = vld [vmem:[#allocation7 + $0x338] sm:$0xff] }
  0x82   :  { %594 = vmatpush.msra.mxu2 %v473_v55  ;;  %616 = vmatpush.msra.mxu3 %v507_v56  ;;  %v669_v55 = vld [vmem:[#allocation7 + $0x320] sm:$0xff] }
  0x83   :  { %574 = vmatpush.msra.mxu1 %v498_v62  ;;  %705 = vmatpush.msrb.mxu0 %v661_v63  ;;  %v633_v56 = vld [vmem:[#allocation7 + $0x200] sm:$0xff]  ;;  %v670_v62 = vld [vmem:[#allocation7 + $0x328] sm:$0xff] }
  0x84   :  { %595 = vmatpush.msra.mxu2 %v471_v60  ;;  %617 = vmatpush.msra.mxu3 %v505_v61  ;;  %v667_v60 = vld [vmem:[#allocation7 + $0x310] sm:$0xff]  ;;  %v636_v61 = vld [vmem:[#allocation7 + $0x218] sm:$0xff]  ;;  %v665_v63 = vld [vmem:[#allocation7 + $0x300] sm:$0xff] }
  0x85   :  { %727 = vmatpush.msrb.mxu1 %v695_v2  ;;  %706 = vmatpush.msrb.mxu0 %v659_v3  ;;  %v666_v2 = vld [vmem:[#allocation7 + $0x308] sm:$0xff]  ;;  %v1821_v3 = vld [vmem:[#allocation6] sm:$0xff] }
  0x86   :  { %596 = vmatpush.msra.mxu2 %v469_v0  ;;  %618 = vmatpush.msra.mxu3 %v503_v1  ;;  %v634_v0 = vld [vmem:[#allocation7 + $0x208] sm:$0xff]  ;;  %v668_v1 = vld [vmem:[#allocation7 + $0x318] sm:$0xff] }
  0x87   :  { %728 = vmatpush.msrb.mxu1 %v693_v7  ;;  %707 = vmatpush.msrb.mxu0 %v657_v10 }
  0x88   :  { %597 = vmatpush.msra.mxu2 %v467_v4  ;;  %619 = vmatpush.msra.mxu3 %v501_v5  ;;  %v250_v4 = vperm.slane %v1821_v3, 0  ;;  %v251_v5 = vperm.slane %v1821_v3, 1 }
  0x89   :  { %729 = vmatpush.msrb.mxu1 %v691_v13  ;;  %708 = vmatpush.msrb.mxu0 %v655_v14  ;;  %v831_v13 = vld [vmem:[#allocation7 + $0x4f0] sm:$0xff]  ;;  %v832_v14 = vld [vmem:[#allocation7 + $0x4f8] sm:$0xff] }
  0x8a   :  { %750 = vmatpush.msrb.mxu2 %v664_v6  ;;  %620 = vmatpush.msra.mxu3 %v499_v8 }
  0x8b   :  { %730 = vmatpush.msrb.mxu1 %v689_v17  ;;  %709 = vmatpush.msrb.mxu0 %v653_v18  ;;  %v830_v17 = vld [vmem:[#allocation7 + $0x4e8] sm:$0xff]  ;;  %v864_v18 = vld [vmem:[#allocation7 + $0x5f8] sm:$0xff] }
  0x8c   :  { %751 = vmatpush.msrb.mxu2 %v662_v11  ;;  %773 = vmatpush.msrb.mxu3 %v696_v12 }
  0x8d   :  { %731 = vmatpush.msrb.mxu1 %v687_v21  ;;  %710 = vmatpush.msrb.mxu0 %v651_v22  ;;  %v828_v22 = vld [vmem:[#allocation7 + $0x4d8] sm:$0xff] }
  0x8e   :  { %752 = vmatpush.msrb.mxu2 %v660_v15  ;;  %774 = vmatpush.msrb.mxu3 %v694_v16  ;;  %v829_v15 = vld [vmem:[#allocation7 + $0x4e0] sm:$0xff]  ;;  %v863_v16 = vld [vmem:[#allocation7 + $0x5f0] sm:$0xff] }
  0x8f   :  { %732 = vmatpush.msrb.mxu1 %v685_v25  ;;  %711 = vmatpush.msrb.mxu0 %v649_v26 }
  0x90   :  { %753 = vmatpush.msrb.mxu2 %v658_v19  ;;  %775 = vmatpush.msrb.mxu3 %v692_v20  ;;  %v827_v19 = vld [vmem:[#allocation7 + $0x4d0] sm:$0xff]  ;;  %v861_v20 = vld [vmem:[#allocation7 + $0x5e0] sm:$0xff] }
  0x91   :  { %733 = vmatpush.msrb.mxu1 %v683_v28  ;;  %712 = vmatpush.msrb.mxu0 %v647_v29  ;;  %v826_v28 = vld [vmem:[#allocation7 + $0x4c8] sm:$0xff]  ;;  %v860_v29 = vld [vmem:[#allocation7 + $0x5d8] sm:$0xff] }
  0x92   :  { %754 = vmatpush.msrb.mxu2 %v656_v23  ;;  %776 = vmatpush.msrb.mxu3 %v690_v24  ;;  %v862_v23 = vld [vmem:[#allocation7 + $0x5e8] sm:$0xff] }
  0x93   :  { %734 = vmatpush.msrb.mxu1 %v681_v32  ;;  %713 = vmatpush.msrb.mxu0 %v645_v33  ;;  %v857_v32 = vld [vmem:[#allocation7 + $0x5c0] sm:$0xff]  ;;  %v252_v33 = vperm.slane %v1821_v3, 2 }
  0x94   :  { %755 = vmatpush.msrb.mxu2 %v654_v27  ;;  %777 = vmatpush.msrb.mxu3 %v688_v59  ;;  %v825_v27 = vld [vmem:[#allocation7 + $0x4c0] sm:$0xff]  ;;  %v859_v59 = vld [vmem:[#allocation7 + $0x5d0] sm:$0xff] }
  0x95   :  { %735 = vmatpush.msrb.mxu1 %v679_v36  ;;  %714 = vmatpush.msrb.mxu0 %v643_v37  ;;  %v858_v36 = vld [vmem:[#allocation7 + $0x5c8] sm:$0xff] }
  0x96   :  { %756 = vmatpush.msrb.mxu2 %v652_v30  ;;  %778 = vmatpush.msrb.mxu3 %v686_v31  ;;  %v823_v31 = vld [vmem:[#allocation7 + $0x4b0] sm:$0xff] }
  0x97   :  { %736 = vmatpush.msrb.mxu1 %v677_v40  ;;  %715 = vmatpush.msrb.mxu0 %v641_v41  ;;  %v253_v40 = vperm.slane %v1821_v3, 3  ;;  %v822_v41 = vld [vmem:[#allocation7 + $0x4a8] sm:$0xff] }
  0x98   :  { %757 = vmatpush.msrb.mxu2 %v650_v34  ;;  %779 = vmatpush.msrb.mxu3 %v684_v35  ;;  %v824_v35 = vld [vmem:[#allocation7 + $0x4b8] sm:$0xff] }
  0x99   :  { %737 = vmatpush.msrb.mxu1 %v675_v43  ;;  %716 = vmatpush.msrb.mxu0 %v639_v44  ;;  %v819_v44 = vld [vmem:[#allocation7 + $0x490] sm:$0xff] }
  0x9a   :  { %758 = vmatpush.msrb.mxu2 %v648_v38  ;;  %780 = vmatpush.msrb.mxu3 %v682_v39  ;;  %v821_v38 = vld [vmem:[#allocation7 + $0x4a0] sm:$0xff]  ;;  %v855_v39 = vld [vmem:[#allocation7 + $0x5b0] sm:$0xff] }
  0x9b   :  { %738 = vmatpush.msrb.mxu1 %v673_v47  ;;  %717 = vmatpush.msrb.mxu0 %v637_v48  ;;  %v854_v47 = vld [vmem:[#allocation7 + $0x5a8] sm:$0xff] }
  0x9c   :  { %759 = vmatpush.msrb.mxu2 %v646_v9  ;;  %781 = vmatpush.msrb.mxu3 %v680_v42  ;;  %v856_v9 = vld [vmem:[#allocation7 + $0x5b8] sm:$0xff] }
  0x9d   :  { %739 = vmatpush.msrb.mxu1 %v671_v51  ;;  %718 = vmatpush.msrb.mxu0 %v635_v52  ;;  %v818_v52 = vld [vmem:[#allocation7 + $0x488] sm:$0xff] }
  0x9e   :  { %760 = vmatpush.msrb.mxu2 %v644_v45  ;;  %782 = vmatpush.msrb.mxu3 %v678_v46  ;;  %v853_v45 = vld [vmem:[#allocation7 + $0x5a0] sm:$0xff]  ;;  %v820_v46 = vld [vmem:[#allocation7 + $0x498] sm:$0xff] }
  0x9f   :  { %740 = vmatpush.msrb.mxu1 %v669_v55  ;;  %719 = vmatpush.msrb.mxu0 %v633_v56  ;;  %v849_v55 = vld [vmem:[#allocation7 + $0x580] sm:$0xff] }
  0xa0   :  { %761 = vmatpush.msrb.mxu2 %v642_v49  ;;  %783 = vmatpush.msrb.mxu3 %v676_v50  ;;  %v817_v49 = vld [vmem:[#allocation7 + $0x480] sm:$0xff]  ;;  %v851_v50 = vld [vmem:[#allocation7 + $0x590] sm:$0xff] }
  0xa1   :  { %741 = vmatpush.msrb.mxu1 %v667_v60 }
  0xa2   :  { %762 = vmatpush.msrb.mxu2 %v640_v53  ;;  %784 = vmatpush.msrb.mxu3 %v674_v54  ;;  %v852_v53 = vld [vmem:[#allocation7 + $0x598] sm:$0xff]  ;;  %v815_v54 = vld [vmem:[#allocation7 + $0x470] sm:$0xff] }
  0xa3   :  { %742 = vmatpush.msrb.mxu1 %v665_v63  ;;  %v814_v63 = vld [vmem:[#allocation7 + $0x468] sm:$0xff] }
  0xa4   :  { %763 = vmatpush.msrb.mxu2 %v638_v57  ;;  %785 = vmatpush.msrb.mxu3 %v672_v58  ;;  %v816_v57 = vld [vmem:[#allocation7 + $0x478] sm:$0xff]  ;;  %v850_v58 = vld [vmem:[#allocation7 + $0x588] sm:$0xff] }
  0xa6   :  { %764 = vmatpush.msrb.mxu2 %v636_v61  ;;  %786 = vmatpush.msrb.mxu3 %v670_v62  ;;  %v813_v61 = vld [vmem:[#allocation7 + $0x460] sm:$0xff]  ;;  %v847_v62 = vld [vmem:[#allocation7 + $0x570] sm:$0xff] }
  0xa8   :  { %765 = vmatpush.msrb.mxu2 %v634_v0  ;;  %787 = vmatpush.msrb.mxu3 %v668_v1  ;;  %v848_v0 = vld [vmem:[#allocation7 + $0x578] sm:$0xff] }
  0xaa   :  { %788 = vmatpush.msrb.mxu3 %v666_v2 }
  0xba   :  { %v283_v6 = vpop.f32.mrf.mxu0  ;;  %v306_v7 = vpop.f32.mrf.mxu1 }
  0xbb   :  { %v284_v8 = vadd.f32 %v283_v6, %v250_v4  ;;  %v307_v10 = vadd.f32 %v306_v7, %v251_v5  ;;  %v812_v6 = vld [vmem:[#allocation7 + $0x458] sm:$0xff]  ;;  %v846_v7 = vld [vmem:[#allocation7 + $0x568] sm:$0xff] }
  0xbd   :  { %v450_v11 = vmax.f32 %v284_v8, 0.0  ;;  %v451_v12 = vmax.f32 %v307_v10, 0.0  ;;  %v809_v10 = vld [vmem:[#allocation7 + $0x440] sm:$0xff] }
  0xbf   :  { %552 = vmatmul.f32.vlgmr.msra.gmra.mxu0 %v450_v11  ;;  %598 = vmatmul.f32.vlgmr.msra.gmra.mxu2 %v450_v11  ;;  %v843_v11 = vld [vmem:[#allocation7 + $0x550] sm:$0xff] }
  0xc0   :  { %872 = vmatpush.msra.mxu0 %v831_v13  ;;  %918 = vmatpush.msra.mxu2 %v832_v14  ;;  %v810_v13 = vld [vmem:[#allocation7 + $0x448] sm:$0xff]  ;;  %v844_v14 = vld [vmem:[#allocation7 + $0x558] sm:$0xff] }
  0xc1   :  { %575 = vmatmul.f32.vlgmr.msra.gmra.mxu1 %v451_v12  ;;  %621 = vmatmul.f32.vlgmr.msra.gmra.mxu3 %v451_v12 }
  0xc2   :  { %873 = vmatpush.msra.mxu0 %v829_v15  ;;  %895 = vmatpush.msra.mxu1 %v863_v16  ;;  %v286_v21 = vpop.f32.mrf.mxu0  ;;  %v309_v24 = vpop.f32.mrf.mxu1  ;;  %v807_v15 = vld [vmem:[#allocation7 + $0x430] sm:$0xff]  ;;  %v841_v16 = vld [vmem:[#allocation7 + $0x540] sm:$0xff] }
  0xc3   :  { %919 = vmatpush.msra.mxu2 %v830_v17  ;;  %941 = vmatpush.msra.mxu3 %v864_v18  ;;  %v287_v25 = vadd.f32 %v286_v21, %v250_v4  ;;  %v310_v26 = vadd.f32 %v309_v24, %v251_v5  ;;  %v811_v4 = vld [vmem:[#allocation7 + $0x450] sm:$0xff]  ;;  %v845_v5 = vld [vmem:[#allocation7 + $0x560] sm:$0xff]  ;;  %v808_v18 = vld [vmem:[#allocation7 + $0x438] sm:$0xff] }
  0xc4   :  { %874 = vmatpush.msra.mxu0 %v827_v19  ;;  %896 = vmatpush.msra.mxu1 %v861_v20  ;;  %v329_v37 = vpop.f32.mrf.mxu2  ;;  %v842_v19 = vld [vmem:[#allocation7 + $0x548] sm:$0xff]  ;;  %v254_v20 = vperm.slane %v1821_v3, 4 }
  0xc5   :  { %v458_v30 = vmax.f32 %v287_v25, 0.0  ;;  %920 = vmatpush.msra.mxu2 %v828_v22  ;;  %942 = vmatpush.msra.mxu3 %v862_v23  ;;  %v459_v34 = vmax.f32 %v310_v26, 0.0  ;;  %v330_v42 = vadd.f32 %v329_v37, %v252_v33  ;;  %v805_v22 = vld [vmem:[#allocation7 + $0x420] sm:$0xff]  ;;  %v839_v23 = vld [vmem:[#allocation7 + $0x530] sm:$0xff]  ;;  %v806_v24 = vld [vmem:[#allocation7 + $0x428] sm:$0xff] }
  0xc6   :  { %875 = vmatpush.msra.mxu0 %v825_v27  ;;  %897 = vmatpush.msra.mxu1 %v859_v59  ;;  %v352_v43 = vpop.f32.mrf.mxu3  ;;  %v840_v25 = vld [vmem:[#allocation7 + $0x538] sm:$0xff]  ;;  %v803_v27 = vld [vmem:[#allocation7 + $0x410] sm:$0xff]  ;;  %v837_v59 = vld [vmem:[#allocation7 + $0x520] sm:$0xff] }
  0xc7   :  { %921 = vmatpush.msra.mxu2 %v826_v28  ;;  %943 = vmatpush.msra.mxu3 %v860_v29  ;;  %v353_v48 = vadd.f32 %v352_v43, %v253_v40  ;;  %v452_v51 = vmax.f32 %v330_v42, 0.0  ;;  %v255_v28 = vperm.slane %v1821_v3, 5  ;;  %v804_v29 = vld [vmem:[#allocation7 + $0x418] sm:$0xff]  ;;  %v1031_v42 = vld [vmem:[#allocation7 + $0x7f0] sm:$0xff] }
  0xc8   :  { %555 = vmatmul.f32.gmra.mxu0 %v458_v30  ;;  %601 = vmatmul.f32.gmra.mxu2 %v458_v30  ;;  %v838_v30 = vld [vmem:[#allocation7 + $0x528] sm:$0xff] }
  0xc9   :  { %876 = vmatpush.msra.mxu0 %v823_v31  ;;  %898 = vmatpush.msra.mxu1 %v857_v32  ;;  %v453_v56 = vmax.f32 %v353_v48, 0.0  ;;  %v801_v32 = vld [vmem:[#allocation7 + $0x400] sm:$0xff] }
  0xca   :  { %922 = vmatpush.msra.mxu2 %v824_v35  ;;  %944 = vmatpush.msra.mxu3 %v858_v36  ;;  %v836_v35 = vld [vmem:[#allocation7 + $0x518] sm:$0xff]  ;;  %v1029_v48 = vld [vmem:[#allocation7 + $0x7e0] sm:$0xff] }
  0xcb   :  { %578 = vmatmul.f32.gmra.mxu1 %v459_v34  ;;  %624 = vmatmul.f32.gmra.mxu3 %v459_v34  ;;  %v802_v34 = vld [vmem:[#allocation7 + $0x408] sm:$0xff] }
  0xcc   :  { %877 = vmatpush.msra.mxu0 %v821_v38  ;;  %899 = vmatpush.msra.mxu1 %v855_v39  ;;  %v332_v60 = vpop.f32.mrf.mxu2  ;;  %v999_v38 = vld [vmem:[#allocation7 + $0x6f0] sm:$0xff]  ;;  %v1000_v39 = vld [vmem:[#allocation7 + $0x6f8] sm:$0xff] }
  0xcd   :  { %923 = vmatpush.msra.mxu2 %v822_v41  ;;  %945 = vmatpush.msra.mxu3 %v856_v9  ;;  %v333_v1 = vadd.f32 %v332_v60, %v252_v33  ;;  %v835_v33 = vld [vmem:[#allocation7 + $0x510] sm:$0xff]  ;;  %v834_v41 = vld [vmem:[#allocation7 + $0x508] sm:$0xff]  ;;  %v997_v9 = vld [vmem:[#allocation7 + $0x6e0] sm:$0xff] }
  0xce   :  { %878 = vmatpush.msra.mxu0 %v819_v44  ;;  %900 = vmatpush.msra.mxu1 %v853_v45  ;;  %v998_v44 = vld [vmem:[#allocation7 + $0x6e8] sm:$0xff]  ;;  %v1032_v45 = vld [vmem:[#allocation7 + $0x7f8] sm:$0xff]  ;;  %v1025_v60 = vld [vmem:[#allocation7 + $0x7c0] sm:$0xff] }
  0xcf   :  { %924 = vmatpush.msra.mxu2 %v820_v46  ;;  %946 = vmatpush.msra.mxu3 %v854_v47  ;;  %v460_v12 = vmax.f32 %v333_v1, 0.0  ;;  %v995_v47 = vld [vmem:[#allocation7 + $0x6d0] sm:$0xff] }
  0xd0   :  { %879 = vmatpush.msra.mxu0 %v817_v49  ;;  %901 = vmatpush.msra.mxu1 %v851_v50  ;;  %v355_v2 = vpop.f32.mrf.mxu3  ;;  %v996_v50 = vld [vmem:[#allocation7 + $0x6d8] sm:$0xff]  ;;  %v1023_v1 = vld [vmem:[#allocation7 + $0x7b0] sm:$0xff] }
  0xd1   :  { %925 = vmatpush.msra.mxu2 %v818_v52  ;;  %947 = vmatpush.msra.mxu3 %v852_v53  ;;  %v356_v8 = vadd.f32 %v355_v2, %v253_v40  ;;  %v833_v40 = vld [vmem:[#allocation7 + $0x500] sm:$0xff] }
  0xd2   :  { %720 = vmatmul.f32.vlgmr.msrb.gmra.mxu0 %v452_v51  ;;  %766 = vmatmul.f32.vlgmr.msrb.gmra.mxu2 %v452_v51  ;;  %v1030_v51 = vld [vmem:[#allocation7 + $0x7e8] sm:$0xff]  ;;  %v993_v53 = vld [vmem:[#allocation7 + $0x6c0] sm:$0xff] }
  0xd3   :  { %880 = vmatpush.msra.mxu0 %v815_v54  ;;  %902 = vmatpush.msra.mxu1 %v849_v55  ;;  %v461_v17 = vmax.f32 %v356_v8, 0.0  ;;  %v1027_v54 = vld [vmem:[#allocation7 + $0x7d0] sm:$0xff]  ;;  %v994_v55 = vld [vmem:[#allocation7 + $0x6c8] sm:$0xff]  ;;  %v988_v8 = vld [vmem:[#allocation7 + $0x698] sm:$0xff] }
  0xd4   :  { %926 = vmatpush.msra.mxu2 %v816_v57  ;;  %948 = vmatpush.msra.mxu3 %v850_v58  ;;  %v991_v58 = vld [vmem:[#allocation7 + $0x6b0] sm:$0xff] }
  0xd5   :  { %743 = vmatmul.f32.vlgmr.msrb.gmra.mxu1 %v453_v56  ;;  %789 = vmatmul.f32.vlgmr.msrb.gmra.mxu3 %v453_v56  ;;  %v1028_v56 = vld [vmem:[#allocation7 + $0x7d8] sm:$0xff] }
  0xd6   :  { %881 = vmatpush.msra.mxu0 %v813_v61  ;;  %903 = vmatpush.msra.mxu1 %v847_v62  ;;  %v992_v62 = vld [vmem:[#allocation7 + $0x6b8] sm:$0xff] }
  0xd7   :  { %927 = vmatpush.msra.mxu2 %v814_v63  ;;  %949 = vmatpush.msra.mxu3 %v848_v0  ;;  %v1026_v63 = vld [vmem:[#allocation7 + $0x7c8] sm:$0xff]  ;;  %v989_v0 = vld [vmem:[#allocation7 + $0x6a0] sm:$0xff] }
  0xd8   :  { %882 = vmatpush.msra.mxu0 %v811_v4  ;;  %904 = vmatpush.msra.mxu1 %v845_v5  ;;  %v990_v4 = vld [vmem:[#allocation7 + $0x6a8] sm:$0xff]  ;;  %v1024_v5 = vld [vmem:[#allocation7 + $0x7b8] sm:$0xff] }
  0xd9   :  { %928 = vmatpush.msra.mxu2 %v812_v6  ;;  %950 = vmatpush.msra.mxu3 %v846_v7  ;;  %v987_v6 = vld [vmem:[#allocation7 + $0x690] sm:$0xff]  ;;  %v1021_v7 = vld [vmem:[#allocation7 + $0x7a0] sm:$0xff] }
  0xda   :  { %883 = vmatpush.msra.mxu0 %v809_v10  ;;  %905 = vmatpush.msra.mxu1 %v843_v11  ;;  %v375_v21 = vpop.f32.mrf.mxu0  ;;  %v398_v31 = vpop.f32.mrf.mxu1  ;;  %v1022_v10 = vld [vmem:[#allocation7 + $0x7a8] sm:$0xff]  ;;  %v985_v11 = vld [vmem:[#allocation7 + $0x680] sm:$0xff] }
  0xdb   :  { %929 = vmatpush.msra.mxu2 %v810_v13  ;;  %951 = vmatpush.msra.mxu3 %v844_v14  ;;  %v376_v26 = vadd.f32 %v375_v21, %v254_v20  ;;  %v399_v37 = vadd.f32 %v398_v31, %v255_v28  ;;  %v986_v13 = vld [vmem:[#allocation7 + $0x688] sm:$0xff]  ;;  %v1020_v14 = vld [vmem:[#allocation7 + $0x798] sm:$0xff]  ;;  %v256_v31 = vperm.slane %v1821_v3, 6 }
  0xdc   :  { %723 = vmatmul.f32.gmra.mxu0 %v460_v12  ;;  %769 = vmatmul.f32.gmra.mxu2 %v460_v12  ;;  %v1019_v12 = vld [vmem:[#allocation7 + $0x790] sm:$0xff]  ;;  %v982_v21 = vld [vmem:[#allocation7 + $0x668] sm:$0xff] }
  0xdd   :  { %884 = vmatpush.msra.mxu0 %v807_v15  ;;  %906 = vmatpush.msra.mxu1 %v841_v16  ;;  %v454_v36 = vmax.f32 %v376_v26, 0.0  ;;  %v455_v43 = vmax.f32 %v399_v37, 0.0  ;;  %v983_v15 = vld [vmem:[#allocation7 + $0x670] sm:$0xff]  ;;  %v1017_v16 = vld [vmem:[#allocation7 + $0x780] sm:$0xff]  ;;  %v1014_v26 = vld [vmem:[#allocation7 + $0x768] sm:$0xff]  ;;  %v257_v37 = vperm.slane %v1821_v3, 7 }
  0xde   :  { %930 = vmatpush.msra.mxu2 %v808_v18  ;;  %952 = vmatpush.msra.mxu3 %v842_v19  ;;  %v1018_v18 = vld [vmem:[#allocation7 + $0x788] sm:$0xff]  ;;  %v981_v19 = vld [vmem:[#allocation7 + $0x660] sm:$0xff] }
  0xdf   :  { %746 = vmatmul.f32.gmra.mxu1 %v461_v17  ;;  %792 = vmatmul.f32.gmra.mxu3 %v461_v17  ;;  %v984_v17 = vld [vmem:[#allocation7 + $0x678] sm:$0xff]  ;;  %v969_v3 = vld [vmem:[#allocation7 + $0x600] sm:$0xff] }
  0xe0   :  { %885 = vmatpush.msra.mxu0 %v805_v22  ;;  %907 = vmatpush.msra.mxu1 %v839_v23  ;;  %v1016_v22 = vld [vmem:[#allocation7 + $0x778] sm:$0xff]  ;;  %v979_v23 = vld [vmem:[#allocation7 + $0x650] sm:$0xff] }
  0xe1   :  { %931 = vmatpush.msra.mxu2 %v806_v24  ;;  %953 = vmatpush.msra.mxu3 %v840_v25  ;;  %v1013_v24 = vld [vmem:[#allocation7 + $0x760] sm:$0xff]  ;;  %v980_v25 = vld [vmem:[#allocation7 + $0x658] sm:$0xff] }
  0xe2   :  { %886 = vmatpush.msra.mxu0 %v803_v27  ;;  %908 = vmatpush.msra.mxu1 %v837_v59  ;;  %v378_v46 = vpop.f32.mrf.mxu0  ;;  %v401_v52 = vpop.f32.mrf.mxu1  ;;  %v977_v27 = vld [vmem:[#allocation7 + $0x640] sm:$0xff]  ;;  %v1011_v59 = vld [vmem:[#allocation7 + $0x750] sm:$0xff] }
  0xe3   :  { %932 = vmatpush.msra.mxu2 %v804_v29  ;;  %954 = vmatpush.msra.mxu3 %v838_v30  ;;  %v379_v49 = vadd.f32 %v378_v46, %v254_v20  ;;  %v402_v57 = vadd.f32 %v401_v52, %v255_v28  ;;  %v1015_v20 = vld [vmem:[#allocation7 + $0x770] sm:$0xff]  ;;  %v978_v29 = vld [vmem:[#allocation7 + $0x648] sm:$0xff]  ;;  %v1012_v30 = vld [vmem:[#allocation7 + $0x758] sm:$0xff] }
  0xe4   :  { %887 = vmatpush.msra.mxu0 %v801_v32  ;;  %909 = vmatpush.msra.mxu1 %v835_v33  ;;  %v975_v32 = vld [vmem:[#allocation7 + $0x630] sm:$0xff]  ;;  %v1009_v33 = vld [vmem:[#allocation7 + $0x740] sm:$0xff]  ;;  %v1006_v46 = vld [vmem:[#allocation7 + $0x728] sm:$0xff] }
  0xe5   :  { %933 = vmatpush.msra.mxu2 %v802_v34  ;;  %955 = vmatpush.msra.mxu3 %v836_v35  ;;  %v462_v61 = vmax.f32 %v379_v49, 0.0  ;;  %v463_v2 = vmax.f32 %v402_v57, 0.0  ;;  %v976_v35 = vld [vmem:[#allocation7 + $0x638] sm:$0xff]  ;;  %v970_v49 = vld [vmem:[#allocation7 + $0x608] sm:$0xff]  ;;  %v1151_v57 = vld [vmem:[#allocation10 + $0x78] sm:$0xff] }
  0xe6   :  { %1040 = vmatpush.msrb.mxu0 %v999_v38  ;;  %910 = vmatpush.msra.mxu1 %v833_v40  ;;  %v973_v38 = vld [vmem:[#allocation7 + $0x620] sm:$0xff] }
  0xe7   :  { %1086 = vmatpush.msrb.mxu2 %v1000_v39  ;;  %888 = vmatmul.f32.vlgmr.msra.gmra.mxu0 %v454_v36  ;;  %v1007_v39 = vld [vmem:[#allocation7 + $0x730] sm:$0xff] }
  0xe8   :  { %934 = vmatmul.f32.vlgmr.msra.gmra.mxu2 %v454_v36  ;;  %956 = vmatpush.msra.mxu3 %v834_v41  ;;  %v1010_v36 = vld [vmem:[#allocation7 + $0x748] sm:$0xff] }
  0xe9   :  { %1041 = vmatpush.msrb.mxu0 %v997_v9  ;;  %1063 = vmatpush.msrb.mxu1 %v1031_v42  ;;  %v974_v41 = vld [vmem:[#allocation7 + $0x628] sm:$0xff]  ;;  %v1008_v9 = vld [vmem:[#allocation7 + $0x738] sm:$0xff]  ;;  %v971_v42 = vld [vmem:[#allocation7 + $0x610] sm:$0xff] }
  0xea   :  { %1087 = vmatpush.msrb.mxu2 %v998_v44  ;;  %1109 = vmatpush.msrb.mxu3 %v1032_v45  ;;  %v972_v45 = vld [vmem:[#allocation7 + $0x618] sm:$0xff] }
  0xeb   :  { %911 = vmatmul.f32.vlgmr.msra.gmra.mxu1 %v455_v43  ;;  %957 = vmatmul.f32.vlgmr.msra.gmra.mxu3 %v455_v43  ;;  %v1005_v43 = vld [vmem:[#allocation7 + $0x720] sm:$0xff] }
  0xec   :  { %1042 = vmatpush.msrb.mxu0 %v995_v47  ;;  %1064 = vmatpush.msrb.mxu1 %v1029_v48  ;;  %v421_v28 = vpop.f32.mrf.mxu2  ;;  %v1003_v47 = vld [vmem:[#allocation7 + $0x710] sm:$0xff] }
  0xed   :  { %1088 = vmatpush.msrb.mxu2 %v996_v50  ;;  %1110 = vmatpush.msrb.mxu3 %v1030_v51  ;;  %v422_v40 = vadd.f32 %v421_v28, %v256_v31  ;;  %v1004_v50 = vld [vmem:[#allocation7 + $0x718] sm:$0xff] }
  0xee   :  { %1043 = vmatpush.msrb.mxu0 %v993_v53  ;;  %1065 = vmatpush.msrb.mxu1 %v1027_v54  ;;  %v444_v34 = vpop.f32.mrf.mxu3  ;;  %v1001_v53 = vld [vmem:[#allocation7 + $0x700] sm:$0xff]  ;;  %v1002_v54 = vld [vmem:[#allocation7 + $0x708] sm:$0xff]  ;;  %v1178_v28 = vld [vmem:[#allocation10 + $0x150] sm:$0xff] }
  0xef   :  { %1089 = vmatpush.msrb.mxu2 %v994_v55  ;;  %1111 = vmatpush.msrb.mxu3 %v1028_v56  ;;  %v445_v44 = vadd.f32 %v444_v34, %v257_v37  ;;  %v456_v48 = vmax.f32 %v422_v40, 0.0  ;;  %v1196_v34 = vld [vmem:[#allocation10 + $0x1e0] sm:$0xff]  ;;  %v1175_v40 = vld [vmem:[#allocation10 + $0x138] sm:$0xff] }
  0xf0   :  { %1044 = vmatpush.msrb.mxu0 %v991_v58  ;;  %1066 = vmatpush.msrb.mxu1 %v1025_v60  ;;  %v1167_v58 = vld [vmem:[#allocation10 + $0xf8] sm:$0xff] }
  0xf1   :  { %1090 = vmatpush.msrb.mxu2 %v992_v62  ;;  %1112 = vmatpush.msrb.mxu3 %v1026_v63  ;;  %v457_v52 = vmax.f32 %v445_v44, 0.0  ;;  %v1183_v60 = vld [vmem:[#allocation10 + $0x178] sm:$0xff]  ;;  %v1150_v63 = vld [vmem:[#allocation10 + $0x70] sm:$0xff] }
  0xf2   :  { %891 = vmatmul.f32.gmra.mxu0 %v462_v61  ;;  %937 = vmatmul.f32.gmra.mxu2 %v462_v61  ;;  %v1199_v61 = vld [vmem:[#allocation10 + $0x1f8] sm:$0xff]  ;;  %v1174_v44 = vld [vmem:[#allocation10 + $0x130] sm:$0xff] }
  0xf3   :  { %1045 = vmatpush.msrb.mxu0 %v989_v0  ;;  %1067 = vmatpush.msrb.mxu1 %v1023_v1  ;;  %v1166_v0 = vld [vmem:[#allocation10 + $0xf0] sm:$0xff] }
  0xf4   :  { %1091 = vmatpush.msrb.mxu2 %v990_v4  ;;  %1113 = vmatpush.msrb.mxu3 %v1024_v5  ;;  %v424_v51 = vpop.f32.mrf.mxu2  ;;  %v1182_v1 = vld [vmem:[#allocation10 + $0x170] sm:$0xff]  ;;  %v1149_v4 = vld [vmem:[#allocation10 + $0x68] sm:$0xff] }
  0xf5   :  { %914 = vmatmul.f32.gmra.mxu1 %v463_v2  ;;  %960 = vmatmul.f32.gmra.mxu3 %v463_v2  ;;  %v425_v56 = vadd.f32 %v424_v51, %v256_v31  ;;  %v1165_v5 = vld [vmem:[#allocation10 + $0xe8] sm:$0xff]  ;;  %v1156_v31 = vld [vmem:[#allocation10 + $0xa0] sm:$0xff]  ;;  %v1191_v51 = vld [vmem:[#allocation10 + $0x1b8] sm:$0xff] }
  0xf6   :  { %1046 = vmatpush.msrb.mxu0 %v987_v6  ;;  %1068 = vmatpush.msrb.mxu1 %v1021_v7  ;;  %v447_v55 = vpop.f32.mrf.mxu3  ;;  %v1148_v7 = vld [vmem:[#allocation10 + $0x60] sm:$0xff] }
  0xf7   :  { %1092 = vmatpush.msrb.mxu2 %v988_v8  ;;  %1114 = vmatpush.msrb.mxu3 %v1022_v10  ;;  %v448_v62 = vadd.f32 %v447_v55, %v257_v37  ;;  %v464_v2 = vmax.f32 %v425_v56, 0.0  ;;  %v1164_v8 = vld [vmem:[#allocation10 + $0xe0] sm:$0xff]  ;;  %v1147_v10 = vld [vmem:[#allocation10 + $0x58] sm:$0xff]  ;;  %v1190_v55 = vld [vmem:[#allocation10 + $0x1b0] sm:$0xff] }
  0xf8   :  { %1047 = vmatpush.msrb.mxu0 %v985_v11  ;;  %1069 = vmatpush.msrb.mxu1 %v1019_v12  ;;  %v1163_v11 = vld [vmem:[#allocation10 + $0xd8] sm:$0xff]  ;;  %v1181_v12 = vld [vmem:[#allocation10 + $0x168] sm:$0xff] }
  0xf9   :  { %1093 = vmatpush.msrb.mxu2 %v986_v13  ;;  %1115 = vmatpush.msrb.mxu3 %v1020_v14  ;;  %v465_v6 = vmax.f32 %v448_v62, 0.0  ;;  %v1146_v13 = vld [vmem:[#allocation10 + $0x50] sm:$0xff]  ;;  %v1195_v37 = vld [vmem:[#allocation10 + $0x1d8] sm:$0xff] }
  0xfa   :  { %1048 = vmatpush.msrb.mxu0 %v983_v15  ;;  %1070 = vmatpush.msrb.mxu1 %v1017_v16  ;;  %v1162_v14 = vld [vmem:[#allocation10 + $0xd0] sm:$0xff]  ;;  %v1180_v15 = vld [vmem:[#allocation10 + $0x160] sm:$0xff]  ;;  %v1145_v16 = vld [vmem:[#allocation10 + $0x48] sm:$0xff] }
  0xfb   :  { %1094 = vmatpush.msrb.mxu2 %v984_v17  ;;  %1116 = vmatpush.msrb.mxu3 %v1018_v18  ;;  %v1161_v17 = vld [vmem:[#allocation10 + $0xc8] sm:$0xff]  ;;  %v1144_v18 = vld [vmem:[#allocation10 + $0x40] sm:$0xff]  ;;  %v1211_v56 = vld [vmem:[#allocation10 + $0x258] sm:$0xff] }
  0xfc   :  { %1049 = vmatpush.msrb.mxu0 %v981_v19  ;;  %1071 = vmatpush.msrb.mxu1 %v1015_v20  ;;  %v1160_v19 = vld [vmem:[#allocation10 + $0xc0] sm:$0xff]  ;;  %v1143_v20 = vld [vmem:[#allocation10 + $0x38] sm:$0xff]  ;;  %v1210_v62 = vld [vmem:[#allocation10 + $0x250] sm:$0xff] }
  0xfd   :  { %1095 = vmatpush.msrb.mxu2 %v982_v21  ;;  %1117 = vmatpush.msrb.mxu3 %v1016_v22  ;;  %v1159_v21 = vld [vmem:[#allocation10 + $0xb8] sm:$0xff]  ;;  %v1142_v22 = vld [vmem:[#allocation10 + $0x30] sm:$0xff] }
  0xfe   :  { %1050 = vmatpush.msrb.mxu0 %v979_v23  ;;  %1072 = vmatpush.msrb.mxu1 %v1013_v24  ;;  %v1158_v23 = vld [vmem:[#allocation10 + $0xb0] sm:$0xff]  ;;  %v1179_v24 = vld [vmem:[#allocation10 + $0x158] sm:$0xff] }
  0xff   :  { %1096 = vmatpush.msrb.mxu2 %v980_v25  ;;  %1118 = vmatpush.msrb.mxu3 %v1014_v26  ;;  %v1141_v25 = vld [vmem:[#allocation10 + $0x28] sm:$0xff]  ;;  %v1198_v26 = vld [vmem:[#allocation10 + $0x1f0] sm:$0xff] }
 0x100   :  { %1051 = vmatpush.msrb.mxu0 %v977_v27  ;;  %1073 = vmatpush.msrb.mxu1 %v1011_v59  ;;  %v1140_v27 = vld [vmem:[#allocation10 + $0x20] sm:$0xff]  ;;  %v1157_v59 = vld [vmem:[#allocation10 + $0xa8] sm:$0xff] }
 0x101   :  { %1097 = vmatpush.msrb.mxu2 %v978_v29  ;;  %1119 = vmatpush.msrb.mxu3 %v1012_v30  ;;  %v1139_v29 = vld [vmem:[#allocation10 + $0x18] sm:$0xff]  ;;  %v1197_v30 = vld [vmem:[#allocation10 + $0x1e8] sm:$0xff] }
 0x102   :  { %1052 = vmatpush.msrb.mxu0 %v975_v32  ;;  %1074 = vmatpush.msrb.mxu1 %v1009_v33  ;;  %v1138_v32 = vld [vmem:[#allocation10 + $0x10] sm:$0xff]  ;;  %v1177_v33 = vld [vmem:[#allocation10 + $0x148] sm:$0xff] }
 0x103   :  { %1098 = vmatpush.msrb.mxu2 %v976_v35  ;;  %1120 = vmatpush.msrb.mxu3 %v1010_v36  ;;  %v1155_v35 = vld [vmem:[#allocation10 + $0x98] sm:$0xff]  ;;  %v1176_v36 = vld [vmem:[#allocation10 + $0x140] sm:$0xff] }
 0x104   :  { %1053 = vmatpush.msrb.mxu0 %v973_v38  ;;  %1075 = vmatpush.msrb.mxu1 %v1007_v39  ;;  %v1137_v38 = vld [vmem:[#allocation10 + $0x8] sm:$0xff]  ;;  %v1154_v39 = vld [vmem:[#allocation10 + $0x90] sm:$0xff] }
 0x105   :  { %1099 = vmatpush.msrb.mxu2 %v974_v41  ;;  %1121 = vmatpush.msrb.mxu3 %v1008_v9  ;;  %v1194_v41 = vld [vmem:[#allocation10 + $0x1d0] sm:$0xff]  ;;  %v1136_v9 = vld [vmem:[#allocation10] sm:$0xff] }
 0x106   :  { %1054 = vmatpush.msrb.mxu0 %v971_v42  ;;  %1076 = vmatpush.msrb.mxu1 %v1005_v43  ;;  %v1215_v42 = vld [vmem:[#allocation10 + $0x278] sm:$0xff]  ;;  %v1153_v43 = vld [vmem:[#allocation10 + $0x88] sm:$0xff] }
 0x107   :  { %1100 = vmatpush.msrb.mxu2 %v972_v45  ;;  %1122 = vmatpush.msrb.mxu3 %v1006_v46  ;;  %v1193_v45 = vld [vmem:[#allocation10 + $0x1c8] sm:$0xff]  ;;  %v1214_v46 = vld [vmem:[#allocation10 + $0x270] sm:$0xff] }
 0x108   :  { %1055 = vmatpush.msrb.mxu0 %v969_v3  ;;  %1077 = vmatpush.msrb.mxu1 %v1003_v47  ;;  %v1152_v3 = vld [vmem:[#allocation10 + $0x80] sm:$0xff]  ;;  %v1173_v47 = vld [vmem:[#allocation10 + $0x128] sm:$0xff] }
 0x109   :  { %1101 = vmatpush.msrb.mxu2 %v970_v49  ;;  %1123 = vmatpush.msrb.mxu3 %v1004_v50  ;;  %v1213_v49 = vld [vmem:[#allocation10 + $0x268] sm:$0xff]  ;;  %v1172_v50 = vld [vmem:[#allocation10 + $0x120] sm:$0xff] }
 0x10a   :  { %1056 = vmatmul.f32.vlgmr.msrb.gmra.mxu0 %v456_v48  ;;  %1102 = vmatmul.f32.vlgmr.msrb.gmra.mxu2 %v456_v48  ;;  %v1192_v48 = vld [vmem:[#allocation10 + $0x1c0] sm:$0xff] }
 0x10b   :  { %1078 = vmatpush.msrb.mxu1 %v1001_v53  ;;  %1124 = vmatpush.msrb.mxu3 %v1002_v54  ;;  %v1212_v53 = vld [vmem:[#allocation10 + $0x260] sm:$0xff]  ;;  %v1171_v54 = vld [vmem:[#allocation10 + $0x118] sm:$0xff] }
 0x10c   :  { %1079 = vmatmul.f32.vlgmr.msrb.gmra.mxu1 %v457_v52  ;;  %1125 = vmatmul.f32.vlgmr.msrb.gmra.mxu3 %v457_v52  ;;  %v1231_v52 = vld [vmem:[#allocation10 + $0x2f8] sm:$0xff] }
 0x10d   :  { %1268 = vmatpush.msra.mxu0 %v1151_v57  ;;  %1291 = vmatpush.msra.mxu1 %v1167_v58  ;;  %v1230_v57 = vld [vmem:[#allocation10 + $0x2f0] sm:$0xff]  ;;  %v1831_v58 = vld [vmem:[#allocation9] sm:$0x3] }
 0x10e   :  { %1314 = vmatpush.msra.mxu2 %v1183_v60  ;;  %1337 = vmatpush.msra.mxu3 %v1199_v61  ;;  %v1170_v60 = vld [vmem:[#allocation10 + $0x110] sm:$0xff]  ;;  %v1189_v61 = vld [vmem:[#allocation10 + $0x1a8] sm:$0xff] }
 0x10f   :  { %1269 = vmatpush.msra.mxu0 %v1150_v63  ;;  %1292 = vmatpush.msra.mxu1 %v1166_v0  ;;  %v1229_v63 = vld [vmem:[#allocation10 + $0x2e8] sm:$0xff] }
 0x110   :  { %1315 = vmatpush.msra.mxu2 %v1182_v1  ;;  %1338 = vmatpush.msra.mxu3 %v1198_v26  ;;  %v1169_v0 = vld [vmem:[#allocation10 + $0x108] sm:$0xff]  ;;  %v1188_v1 = vld [vmem:[#allocation10 + $0x1a0] sm:$0xff] }
 0x111   :  { %1270 = vmatpush.msra.mxu0 %v1149_v4  ;;  %1293 = vmatpush.msra.mxu1 %v1165_v5  ;;  %v1228_v4 = vld [vmem:[#allocation10 + $0x2e0] sm:$0xff] }
 0x112   :  { %1059 = vmatmul.f32.gmra.mxu0 %v464_v2  ;;  %1105 = vmatmul.f32.gmra.mxu2 %v464_v2  ;;  %v1209_v2 = vld [vmem:[#allocation10 + $0x248] sm:$0xff]  ;;  %v1168_v5 = vld [vmem:[#allocation10 + $0x100] sm:$0xff] }
 0x113   :  { %1271 = vmatpush.msra.mxu0 %v1148_v7  ;;  %1294 = vmatpush.msra.mxu1 %v1164_v8  ;;  %v1208_v7 = vld [vmem:[#allocation10 + $0x240] sm:$0xff]  ;;  %v1227_v8 = vld [vmem:[#allocation10 + $0x2d8] sm:$0xff] }
 0x114   :  { %1082 = vmatmul.f32.gmra.mxu1 %v465_v6  ;;  %1128 = vmatmul.f32.gmra.mxu3 %v465_v6  ;;  %v1187_v6 = vld [vmem:[#allocation10 + $0x198] sm:$0xff]  ;;  %v1204_v26 = vld [vmem:[#allocation10 + $0x220] sm:$0xff] }
 0x115   :  { %1272 = vmatpush.msra.mxu0 %v1147_v10  ;;  %1295 = vmatpush.msra.mxu1 %v1163_v11  ;;  %v532_v10 = vperm.slane %v1831_v58, 0  ;;  %v1186_v11 = vld [vmem:[#allocation10 + $0x190] sm:$0xff] }
 0x116   :  { %1316 = vmatpush.msra.mxu2 %v1181_v12  ;;  %1339 = vmatpush.msra.mxu3 %v1197_v30  ;;  %v1207_v12 = vld [vmem:[#allocation10 + $0x238] sm:$0xff] }
 0x117   :  { %1273 = vmatpush.msra.mxu0 %v1146_v13  ;;  %1296 = vmatpush.msra.mxu1 %v1162_v14  ;;  %v1226_v13 = vld [vmem:[#allocation10 + $0x2d0] sm:$0xff] }
 0x118   :  { %1317 = vmatpush.msra.mxu2 %v1180_v15  ;;  %1340 = vmatpush.msra.mxu3 %v1196_v34 }
 0x119   :  { %1274 = vmatpush.msra.mxu0 %v1145_v16  ;;  %1297 = vmatpush.msra.mxu1 %v1161_v17 }
 0x11a   :  { %1318 = vmatpush.msra.mxu2 %v1179_v24  ;;  %1341 = vmatpush.msra.mxu3 %v1195_v37  ;;  %v1224_v24 = vld [vmem:[#allocation10 + $0x2c0] sm:$0xff] }
 0x11b   :  { %1275 = vmatpush.msra.mxu0 %v1144_v18  ;;  %1298 = vmatpush.msra.mxu1 %v1160_v19  ;;  %v533_v18 = vperm.slane %v1831_v58, 1  ;;  %v1185_v19 = vld [vmem:[#allocation10 + $0x188] sm:$0xff] }
 0x11c   :  { %1319 = vmatpush.msra.mxu2 %v1178_v28  ;;  %1342 = vmatpush.msra.mxu3 %v1194_v41  ;;  %v1245_v58 = vld [vmem:[#allocation10 + $0x368] sm:$0xff] }
 0x11d   :  { %1276 = vmatpush.msra.mxu0 %v1143_v20  ;;  %1299 = vmatpush.msra.mxu1 %v1159_v21  ;;  %v1206_v20 = vld [vmem:[#allocation10 + $0x230] sm:$0xff]  ;;  %v1225_v21 = vld [vmem:[#allocation10 + $0x2c8] sm:$0xff] }
 0x11e   :  { %1320 = vmatpush.msra.mxu2 %v1177_v33  ;;  %1343 = vmatpush.msra.mxu3 %v1193_v45  ;;  %v1222_v33 = vld [vmem:[#allocation10 + $0x2b0] sm:$0xff] }
 0x11f   :  { %1277 = vmatpush.msra.mxu0 %v1142_v22  ;;  %1300 = vmatpush.msra.mxu1 %v1158_v23  ;;  %v1184_v22 = vld [vmem:[#allocation10 + $0x180] sm:$0xff]  ;;  %v1205_v23 = vld [vmem:[#allocation10 + $0x228] sm:$0xff] }
 0x120   :  { %1321 = vmatpush.msra.mxu2 %v1176_v36  ;;  %1344 = vmatpush.msra.mxu3 %v1192_v48 }
 0x121   :  { %1278 = vmatpush.msra.mxu0 %v1141_v25  ;;  %1301 = vmatpush.msra.mxu1 %v1157_v59  ;;  %v1223_v59 = vld [vmem:[#allocation10 + $0x2b8] sm:$0xff] }
 0x122   :  { %1322 = vmatpush.msra.mxu2 %v1175_v40  ;;  %1345 = vmatpush.msra.mxu3 %v1191_v51  ;;  %v1221_v40 = vld [vmem:[#allocation10 + $0x2a8] sm:$0xff] }
 0x123   :  { %1279 = vmatpush.msra.mxu0 %v1140_v27  ;;  %1302 = vmatpush.msra.mxu1 %v1156_v31 }
 0x124   :  { %1323 = vmatpush.msra.mxu2 %v1174_v44  ;;  %1346 = vmatpush.msra.mxu3 %v1190_v55 }
 0x125   :  { %1280 = vmatpush.msra.mxu0 %v1139_v29  ;;  %1303 = vmatpush.msra.mxu1 %v1155_v35 }
 0x126   :  { %1324 = vmatpush.msra.mxu2 %v1173_v47  ;;  %1347 = vmatpush.msra.mxu3 %v1189_v61  ;;  %v1200_v47 = vld [vmem:[#allocation10 + $0x200] sm:$0xff] }
 0x127   :  { %1281 = vmatpush.msra.mxu0 %v1138_v32  ;;  %1304 = vmatpush.msra.mxu1 %v1154_v39  ;;  %v1203_v32 = vld [vmem:[#allocation10 + $0x218] sm:$0xff]  ;;  %v1202_v39 = vld [vmem:[#allocation10 + $0x210] sm:$0xff]  ;;  %v1216_v61 = vld [vmem:[#allocation10 + $0x280] sm:$0xff] }
 0x128   :  { %1325 = vmatpush.msra.mxu2 %v1172_v50  ;;  %1348 = vmatpush.msra.mxu3 %v1188_v1 }
 0x129   :  { %1282 = vmatpush.msra.mxu0 %v1137_v38  ;;  %1305 = vmatpush.msra.mxu1 %v1153_v43  ;;  %v1835_v38 = vld [vmem:[#allocation9 + $0x2] sm:$0x3]  ;;  %v1220_v43 = vld [vmem:[#allocation10 + $0x2a0] sm:$0xff] }
 0x12a   :  { %1326 = vmatpush.msra.mxu2 %v1171_v54  ;;  %1349 = vmatpush.msra.mxu3 %v1187_v6  ;;  %v700_v45 = vperm.slane %v1835_v38, 0 }
 0x12b   :  { %1283 = vmatpush.msra.mxu0 %v1136_v9  ;;  %1306 = vmatpush.msra.mxu1 %v1152_v3  ;;  %v1247_v3 = vld [vmem:[#allocation10 + $0x378] sm:$0xff] }
 0x12c   :  { %1327 = vmatpush.msra.mxu2 %v1170_v60  ;;  %1350 = vmatpush.msra.mxu3 %v1186_v11 }
 0x12d   :  { %1360 = vmatpush.msrb.mxu0 %v1215_v42  ;;  %1383 = vmatpush.msrb.mxu1 %v1231_v52  ;;  %v1201_v42 = vld [vmem:[#allocation10 + $0x208] sm:$0xff]  ;;  %v1218_v52 = vld [vmem:[#allocation10 + $0x290] sm:$0xff] }
 0x12e   :  { %1328 = vmatpush.msra.mxu2 %v1169_v0  ;;  %1351 = vmatpush.msra.mxu3 %v1185_v19 }
 0x12f   :  { %1361 = vmatpush.msrb.mxu0 %v1214_v46  ;;  %1384 = vmatpush.msrb.mxu1 %v1230_v57  ;;  %v1219_v46 = vld [vmem:[#allocation10 + $0x298] sm:$0xff]  ;;  %v1217_v57 = vld [vmem:[#allocation10 + $0x288] sm:$0xff] }
 0x130   :  { %1329 = vmatpush.msra.mxu2 %v1168_v5  ;;  %1352 = vmatpush.msra.mxu3 %v1184_v22  ;;  %v1262_v5 = vld [vmem:[#allocation10 + $0x3f0] sm:$0xff]  ;;  %v1839_v22 = vld [vmem:[#allocation9 + $0x4] sm:$0x3] }
 0x131   :  { %1362 = vmatpush.msrb.mxu0 %v1213_v49  ;;  %1385 = vmatpush.msrb.mxu1 %v1229_v63  ;;  %v1263_v63 = vld [vmem:[#allocation10 + $0x3f8] sm:$0xff] }
 0x132   :  { %1406 = vmatpush.msrb.mxu2 %v1247_v3  ;;  %1429 = vmatpush.msrb.mxu3 %v1263_v63 }
 0x133   :  { %1363 = vmatpush.msrb.mxu0 %v1212_v53  ;;  %1386 = vmatpush.msrb.mxu1 %v1228_v4  ;;  %v1246_v53 = vld [vmem:[#allocation10 + $0x370] sm:$0xff]  ;;  %v1243_v4 = vld [vmem:[#allocation10 + $0x358] sm:$0xff] }
 0x134   :  { %1407 = vmatpush.msrb.mxu2 %v1246_v53  ;;  %1430 = vmatpush.msrb.mxu3 %v1262_v5 }
 0x135   :  { %1364 = vmatpush.msrb.mxu0 %v1211_v56  ;;  %1387 = vmatpush.msrb.mxu1 %v1227_v8  ;;  %v701_v56 = vperm.slane %v1835_v38, 1  ;;  %v1261_v8 = vld [vmem:[#allocation10 + $0x3e8] sm:$0xff]  ;;  %v1254_v38 = vld [vmem:[#allocation10 + $0x3b0] sm:$0xff] }
 0x136   :  { %1408 = vmatpush.msrb.mxu2 %v1245_v58  ;;  %1431 = vmatpush.msrb.mxu3 %v1261_v8 }
 0x137   :  { %1365 = vmatpush.msrb.mxu0 %v1210_v62  ;;  %1388 = vmatpush.msrb.mxu1 %v1226_v13  ;;  %v1244_v62 = vld [vmem:[#allocation10 + $0x360] sm:$0xff]  ;;  %v1241_v13 = vld [vmem:[#allocation10 + $0x348] sm:$0xff] }
 0x138   :  { %1409 = vmatpush.msrb.mxu2 %v1244_v62 }
 0x139   :  { %1366 = vmatpush.msrb.mxu0 %v1209_v2  ;;  %1389 = vmatpush.msrb.mxu1 %v1225_v21  ;;  %v1258_v21 = vld [vmem:[#allocation10 + $0x3d0] sm:$0xff] }
 0x13a   :  { %1410 = vmatpush.msrb.mxu2 %v1243_v4 }
 0x13b   :  { %1367 = vmatpush.msrb.mxu0 %v1208_v7  ;;  %1390 = vmatpush.msrb.mxu1 %v1224_v24  ;;  %v1242_v7 = vld [vmem:[#allocation10 + $0x350] sm:$0xff] }
 0x13c   :  { %v553_v14 = vpop.f32.mrf.mxu0  ;;  %1411 = vmatpush.msrb.mxu2 %v1242_v7 }
 0x13d   :  { %v554_v15 = vadd.f32 %v553_v14, %v532_v10  ;;  %1368 = vmatpush.msrb.mxu0 %v1207_v12  ;;  %1391 = vmatpush.msrb.mxu1 %v1223_v59  ;;  %v1260_v14 = vld [vmem:[#allocation10 + $0x3e0] sm:$0xff]  ;;  %v868_v59 = vperm.slane %v1839_v22, 0 }
 0x13e   :  { %v576_v16 = vpop.f32.mrf.mxu1  ;;  %1432 = vmatpush.msrb.mxu3 %v1260_v14  ;;  %1412 = vmatpush.msrb.mxu2 %v1241_v13 }
 0x13f   :  { %v577_v17 = vadd.f32 %v576_v16, %v554_v15  ;;  %1369 = vmatpush.msrb.mxu0 %v1206_v20  ;;  %1392 = vmatpush.msrb.mxu1 %v1222_v33  ;;  %v1240_v16 = vld [vmem:[#allocation10 + $0x340] sm:$0xff]  ;;  %v1239_v20 = vld [vmem:[#allocation10 + $0x338] sm:$0xff] }
 0x140   :  { %1413 = vmatpush.msrb.mxu2 %v1240_v16  ;;  %v1255_v33 = vld [vmem:[#allocation10 + $0x3b8] sm:$0xff] }
 0x141   :  { %v628_v25 = vmax.f32 %v577_v17, 0.0  ;;  %1370 = vmatpush.msrb.mxu0 %v1205_v23  ;;  %1393 = vmatpush.msrb.mxu1 %v1221_v40  ;;  %v1259_v17 = vld [vmem:[#allocation10 + $0x3d8] sm:$0xff]  ;;  %v869_v40 = vperm.slane %v1839_v22, 1 }
 0x142   :  { %v599_v27 = vpop.f32.mrf.mxu2  ;;  %1433 = vmatpush.msrb.mxu3 %v1259_v17  ;;  %1414 = vmatpush.msrb.mxu2 %v1239_v20 }
 0x143   :  { %v600_v28 = vadd.f32 %v599_v27, %v533_v18  ;;  %1284 = vmatmul.f32.vlgmr.msra.gmra.mxu0 %v628_v25  ;;  %1394 = vmatpush.msrb.mxu1 %v1220_v43  ;;  %v1238_v25 = vld [vmem:[#allocation10 + $0x330] sm:$0xff]  ;;  %v1233_v43 = vld [vmem:[#allocation10 + $0x308] sm:$0xff] }
 0x144   :  { %v622_v29 = vpop.f32.mrf.mxu3  ;;  %1371 = vmatpush.msrb.mxu0 %v1204_v26  ;;  %v1257_v26 = vld [vmem:[#allocation10 + $0x3c8] sm:$0xff]  ;;  %1434 = vmatpush.msrb.mxu3 %v1258_v21 }
 0x145   :  { %v556_v30 = vpop.f32.mrf.mxu0  ;;  %v623_v31 = vadd.f32 %v622_v29, %v600_v28  ;;  %1395 = vmatpush.msrb.mxu1 %v1219_v46  ;;  %v1237_v28 = vld [vmem:[#allocation10 + $0x328] sm:$0xff]  ;;  %v1256_v29 = vld [vmem:[#allocation10 + $0x3c0] sm:$0xff]  ;;  %1415 = vmatpush.msrb.mxu2 %v1238_v25 }
 0x146   :  { %v557_v34 = vadd.f32 %v556_v30, %v532_v10  ;;  %1372 = vmatpush.msrb.mxu0 %v1203_v32  ;;  %1435 = vmatpush.msrb.mxu3 %v1257_v26  ;;  %v1236_v32 = vld [vmem:[#allocation10 + $0x320] sm:$0xff] }
 0x147   :  { %v629_v35 = vmax.f32 %v623_v31, 0.0  ;;  %1396 = vmatpush.msrb.mxu1 %v1218_v52  ;;  %1416 = vmatpush.msrb.mxu2 %v1237_v28 }
 0x148   :  { %v579_v36 = vpop.f32.mrf.mxu1  ;;  %1373 = vmatpush.msrb.mxu0 %v1202_v39  ;;  %1436 = vmatpush.msrb.mxu3 %v1256_v29 }
 0x149   :  { %v580_v37 = vadd.f32 %v579_v36, %v557_v34  ;;  %1307 = vmatmul.f32.vlgmr.msra.gmra.mxu1 %v629_v35  ;;  %1417 = vmatpush.msrb.mxu2 %v1236_v32 }
 0x14a   :  { %1374 = vmatpush.msrb.mxu0 %v1201_v42  ;;  %1397 = vmatpush.msrb.mxu1 %v1217_v57  ;;  %v1248_v57 = vld [vmem:[#allocation10 + $0x380] sm:$0xff] }
 0x14b   :  { %v630_v41 = vmax.f32 %v580_v37, 0.0  ;;  %v602_v9 = vpop.f32.mrf.mxu2  ;;  %1437 = vmatpush.msrb.mxu3 %v1255_v33  ;;  %v1235_v37 = vld [vmem:[#allocation10 + $0x318] sm:$0xff] }
 0x14c   :  { %v603_v44 = vadd.f32 %v602_v9, %v533_v18  ;;  %1375 = vmatpush.msrb.mxu0 %v1200_v47  ;;  %1398 = vmatpush.msrb.mxu1 %v1216_v61  ;;  %v1253_v9 = vld [vmem:[#allocation10 + $0x3a8] sm:$0xff]  ;;  %v1232_v47 = vld [vmem:[#allocation10 + $0x300] sm:$0xff] }
 0x14d   :  { %1287 = vmatmul.f32.gmra.mxu0 %v630_v41  ;;  %1418 = vmatpush.msrb.mxu2 %v1235_v37  ;;  %v1234_v41 = vld [vmem:[#allocation10 + $0x310] sm:$0xff] }
 0x14e   :  { %v625_v48 = vpop.f32.mrf.mxu3  ;;  %1438 = vmatpush.msrb.mxu3 %v1254_v38 }
 0x14f   :  { %v626_v49 = vadd.f32 %v625_v48, %v603_v44  ;;  %v721_v50 = vpop.f32.mrf.mxu0  ;;  %1419 = vmatpush.msrb.mxu2 %v1234_v41  ;;  %v1252_v44 = vld [vmem:[#allocation10 + $0x3a0] sm:$0xff]  ;;  %v1251_v48 = vld [vmem:[#allocation10 + $0x398] sm:$0xff] }
 0x150   :  { %v722_v51 = vadd.f32 %v721_v50, %v700_v45  ;;  %1439 = vmatpush.msrb.mxu3 %v1253_v9  ;;  %v1250_v50 = vld [vmem:[#allocation10 + $0x390] sm:$0xff] }
 0x151   :  { %v631_v54 = vmax.f32 %v626_v49, 0.0  ;;  %1420 = vmatpush.msrb.mxu2 %v1233_v43 }
 0x152   :  { %v744_v55 = vpop.f32.mrf.mxu1  ;;  %1440 = vmatpush.msrb.mxu3 %v1252_v44 }
 0x153   :  { %v745_v60 = vadd.f32 %v744_v55, %v722_v51  ;;  %1310 = vmatmul.f32.gmra.mxu1 %v631_v54  ;;  %1421 = vmatpush.msrb.mxu2 %v1232_v47  ;;  %v1249_v54 = vld [vmem:[#allocation10 + $0x388] sm:$0xff] }
 0x154   :  { %1441 = vmatpush.msrb.mxu3 %v1251_v48 }
 0x155   :  { %v796_v0 = vmax.f32 %v745_v60, 0.0  ;;  %v767_v1 = vpop.f32.mrf.mxu2 }
 0x156   :  { %v768_v2 = vadd.f32 %v767_v1, %v701_v56  ;;  %1442 = vmatpush.msrb.mxu3 %v1250_v50 }
 0x157   :  { %1330 = vmatmul.f32.vlgmr.msra.gmra.mxu2 %v796_v0 }
 0x158   :  { %v790_v6 = vpop.f32.mrf.mxu3  ;;  %1443 = vmatpush.msrb.mxu3 %v1249_v54 }
 0x159   :  { %v724_v10 = vpop.f32.mrf.mxu0  ;;  %v791_v11 = vadd.f32 %v790_v6, %v768_v2  ;;  %v1034_v2 = vld [vmem:[#allocation9 + $0x6] sm:$0x3] }
 0x15a   :  { %v725_v12 = vadd.f32 %v724_v10, %v700_v45  ;;  %1444 = vmatpush.msrb.mxu3 %v1248_v57  ;;  %v1036_v4 = vperm.slane %v1034_v2, 0  ;;  %v1037_v10 = vperm.slane %v1034_v2, 1 }
 0x15b   :  { %v797_v15 = vmax.f32 %v791_v11, 0.0 }
 0x15c   :  { %v747_v18 = vpop.f32.mrf.mxu1 }
 0x15d   :  { %v748_v19 = vadd.f32 %v747_v18, %v725_v12  ;;  %1353 = vmatmul.f32.vlgmr.msra.gmra.mxu3 %v797_v15 }
 0x15f   :  { %v798_v23 = vmax.f32 %v748_v19, 0.0  ;;  %v770_v24 = vpop.f32.mrf.mxu2 }
 0x160   :  { %v771_v27 = vadd.f32 %v770_v24, %v701_v56 }
 0x161   :  { %1333 = vmatmul.f32.gmra.mxu2 %v798_v23 }
 0x162   :  { %v793_v30 = vpop.f32.mrf.mxu3 }
 0x163   :  { %v794_v31 = vadd.f32 %v793_v30, %v771_v27 }
 0x164   :  { %v889_v34 = vpop.f32.mrf.mxu0 }
 0x165   :  { %v799_v35 = vmax.f32 %v794_v31, 0.0  ;;  %v890_v36 = vadd.f32 %v889_v34, %v868_v59  ;;  %v1560_v31 = vld [vmem:[%s1894_s6] ss:$0 sm:$0xff] }
 0x167   :  { %1356 = vmatmul.f32.gmra.mxu3 %v799_v35 }
 0x168   :  { %v912_v39 = vpop.f32.mrf.mxu1 }
 0x169   :  { %v913_v42 = vadd.f32 %v912_v39, %v890_v36 }
 0x16b   :  { %v964_v45 = vmax.f32 %v913_v42, 0.0  ;;  %v935_v46 = vpop.f32.mrf.mxu2  ;;  %v1452_v42 = vlaneseq }
 0x16c   :  { %v936_v3 = vadd.f32 %v935_v46, %v869_v40 }
 0x16d   :  { %1376 = vmatmul.f32.vlgmr.msrb.gmra.mxu0 %v964_v45  ;;  %v1846_v46 = vand.u32 127, %v1452_v42 }
 0x16e   :  { %v958_v49 = vpop.f32.mrf.mxu3 }
 0x16f   :  { %v892_v51 = vpop.f32.mrf.mxu0  ;;  %v959_v52 = vadd.f32 %v958_v49, %v936_v3  ;;  %vm1454_vm0 = vcmp.lt.s32.totalorder %v1846_v46, 4  ;;  %vm1455_vm5 = vcmp.lt.s32.totalorder %v1846_v46, 7 }
 0x170   :  { %v893_v53 = vadd.f32 %v892_v51, %v868_v59 }
 0x171   :  { %v965_v55 = vmax.f32 %v959_v52, 0.0 }
 0x172   :  { %v915_v56 = vpop.f32.mrf.mxu1 }
 0x173   :  { %v916_v58 = vadd.f32 %v915_v56, %v893_v53  ;;  %1399 = vmatmul.f32.vlgmr.msrb.gmra.mxu1 %v965_v55 }
 0x175   :  { %v966_v60 = vmax.f32 %v916_v58, 0.0  ;;  %v938_v61 = vpop.f32.mrf.mxu2 }
 0x176   :  { %v939_v62 = vadd.f32 %v938_v61, %v869_v40 }
 0x177   :  { %1379 = vmatmul.f32.gmra.mxu0 %v966_v60 }
 0x178   :  { %v961_v63 = vpop.f32.mrf.mxu3 }
 0x179   :  { %v962_v0 = vadd.f32 %v961_v63, %v939_v62 }
 0x17b   :  { %v967_v1 = vmax.f32 %v962_v0, 0.0 }
 0x17d   :  { %1402 = vmatmul.f32.gmra.mxu1 %v967_v1 }
 0x187   :  { %v1057_v5 = vpop.f32.mrf.mxu0 }
 0x188   :  { %v1058_v6 = vadd.f32 %v1057_v5, %v1036_v4 }
 0x189   :  { %v1080_v7 = vpop.f32.mrf.mxu1 }
 0x18a   :  { %v1081_v8 = vadd.f32 %v1080_v7, %v1058_v6 }
 0x18c   :  { %v1132_v11 = vmax.f32 %v1081_v8, 0.0 }
 0x18d   :  { %v1103_v12 = vpop.f32.mrf.mxu2 }
 0x18e   :  { %v1104_v13 = vadd.f32 %v1103_v12, %v1037_v10  ;;  %1422 = vmatmul.f32.vlgmr.msrb.gmra.mxu2 %v1132_v11 }
 0x18f   :  { %v1060_v14 = vpop.f32.mrf.mxu0  ;;  %v1126_v15 = vpop.f32.mrf.mxu3 }
 0x190   :  { %v1061_v16 = vadd.f32 %v1060_v14, %v1036_v4  ;;  %v1127_v17 = vadd.f32 %v1126_v15, %v1104_v13 }
 0x191   :  { %v1083_v18 = vpop.f32.mrf.mxu1 }
 0x192   :  { %v1133_v19 = vmax.f32 %v1127_v17, 0.0  ;;  %v1084_v20 = vadd.f32 %v1083_v18, %v1061_v16 }
 0x194   :  { %v1134_v21 = vmax.f32 %v1084_v20, 0.0  ;;  %1445 = vmatmul.f32.vlgmr.msrb.gmra.mxu3 %v1133_v19 }
 0x195   :  { %v1106_v22 = vpop.f32.mrf.mxu2 }
 0x196   :  { %v1107_v23 = vadd.f32 %v1106_v22, %v1037_v10  ;;  %1425 = vmatmul.f32.gmra.mxu2 %v1134_v21 }
 0x197   :  { %v1129_v24 = vpop.f32.mrf.mxu3 }
 0x198   :  { %v1130_v25 = vadd.f32 %v1129_v24, %v1107_v23 }
 0x19a   :  { %v1135_v26 = vmax.f32 %v1130_v25, 0.0 }
 0x19c   :  { %1448 = vmatmul.f32.gmra.mxu3 %v1135_v26 }
 0x1c0   :  { %v1285_v27 = vpop.f32.mrf.mxu0 }
 0x1c1   :  { %v1286_v34 = vadd.f32 %v1560_v31, %v1285_v27 }
 0x1c6   :  { %v1308_v59 = vpop.f32.mrf.mxu1 }
 0x1c7   :  { %v1309_v35 = vadd.f32 %v1308_v59, %v1286_v34 }
 0x1ca   :  { %v1288_v29 = vpop.f32.mrf.mxu0 }
 0x1cb   :  { %v1289_v40 = vadd.f32 %v1560_v31, %v1288_v29 }
 0x1d0   :  { %v1311_v32 = vpop.f32.mrf.mxu1 }
 0x1d1   :  { %v1312_v44 = vadd.f32 %v1311_v32, %v1289_v40 }
 0x1da   :  { %v1331_v28 = vpop.f32.mrf.mxu2 }
 0x1db   :  { %v1332_v37 = vadd.f32 %v1331_v28, %v1309_v35 }
 0x1e0   :  { %v1354_v30 = vpop.f32.mrf.mxu3 }
 0x1e1   :  { %v1355_v41 = vadd.f32 %v1354_v30, %v1332_v37 }
 0x1e4   :  { %v1334_v33 = vpop.f32.mrf.mxu2 }
 0x1e5   :  { %v1335_v3 = vadd.f32 %v1334_v33, %v1312_v44 }
 0x1ea   :  { %v1377_v36 = vpop.f32.mrf.mxu0  ;;  %v1357_v38 = vpop.f32.mrf.mxu3 }
 0x1eb   :  { %v1378_v43 = vadd.f32 %v1377_v36, %v1355_v41  ;;  %v1358_v50 = vadd.f32 %v1357_v38, %v1335_v3 }
 0x1f0   :  { %v1400_v39 = vpop.f32.mrf.mxu1 }
 0x1f1   :  { %v1401_v45 = vadd.f32 %v1400_v39, %v1378_v43 }
 0x1f4   :  { %v1380_v48 = vpop.f32.mrf.mxu0 }
 0x1f5   :  { %v1381_v53 = vadd.f32 %v1380_v48, %v1358_v50 }
 0x1fa   :  { %v1403_v52 = vpop.f32.mrf.mxu1 }
 0x1fb   :  { %v1404_v56 = vadd.f32 %v1403_v52, %v1381_v53 }
 0x211   :  { %v1423_v9 = vpop.f32.mrf.mxu2 }
 0x212   :  { %v1424_v47 = vadd.f32 %v1423_v9, %v1401_v45 }
 0x217   :  { %v1446_v49 = vpop.f32.mrf.mxu3 }
 0x218   :  { %v1848_v51 = vadd.f32 %v1446_v49, %v1424_v47 }
 0x219   :  { %v1426_v55 = vpop.f32.mrf.mxu2 }
 0x21a   :  { %v1456_v54 = vmul.f32 %v1848_v51, %v1848_v51  ;;  %v1427_v58 = vadd.f32 %v1426_v55, %v1404_v56  ;;  %v1490_v0 = vmul.f32 100.0, %v1848_v51  ;;  %v1522_v13 = vmul.f32 0.5, %v1848_v51 }
 0x21c   :  { %v1460_v57 = vsel %vm1454_vm0, %v1456_v54, 0.0  ;;  %v1494_v1 = vmin.f32 %v1490_v0, 20.0  ;;  %vm1492_vm3 = vcmp.gt.f32.partialorder %v1490_v0, 20.0 }
 0x21d   :  { %1462 = vadd.xlane.f32.xlu0 %v1460_v57 }
 0x21e   :  { %v1496_v2 = vmul.f32 1.442695, %v1494_v1 }
 0x21f   :  { %v1449_v60 = vpop.f32.mrf.mxu3 }
 0x220   :  { %v1855_v61 = vadd.f32 %v1449_v60, %v1427_v58  ;;  %1561 = vpow2.f32 %v1496_v2 }
 0x222   :  { %v1457_v62 = vmul.f32 %v1855_v61, %v1855_v61  ;;  %v1863_v4 = vmul.f32 100.0, %v1855_v61  ;;  %v1523_v26 = vmul.f32 0.5, %v1855_v61 }
 0x224   :  { %v1461_v63 = vsel %vm1454_vm0, %v1457_v62, 0.0  ;;  %v1495_v5 = vmin.f32 %v1863_v4, 20.0  ;;  %vm1493_vm9 = vcmp.gt.f32.partialorder %v1863_v4, 20.0 }
 0x225   :  { %1464 = vadd.xlane.f32.xlu0 %v1461_v63 }
 0x226   :  { %v1498_v6 = vmul.f32 1.442695, %v1495_v5  ;;  %v1562_v7 = vpop.eup %1561 }
 0x227   :  { %v1500_v8 = vadd.f32 1.0, %v1562_v7  ;;  %v1503_v14 = vmul.f32 -0.5, %v1562_v7  ;;  %v1506_v18 = vand.u32 2147483647, %v1562_v7 }
 0x228   :  { %1563 = vpow2.f32 %v1498_v6 }
 0x229   :  { %1565 = vlog2.f32 %v1500_v8  ;;  %v1504_v17 = vadd.f32 1.0, %v1503_v14  ;;  %vm1507_vm1 = vcmp.lt.f32.partialorder %v1506_v18, 0.0004427343 }
 0x22b   :  { %v1505_v23 = vmul.f32 %v1562_v7, %v1504_v17 }
 0x22e   :  { %v1564_v10 = vpop.eup %1563 }
 0x22f   :  { %v1509_v15 = vadd.f32 1.0, %v1564_v10  ;;  %v1566_v16 = vpop.eup %1565  ;;  %v1512_v24 = vmul.f32 -0.5, %v1564_v10  ;;  %v1515_v33 = vand.u32 2147483647, %v1564_v10 }
 0x230   :  { %v1502_v19 = vmul.f32 0.6931472, %v1566_v16 }
 0x231   :  { %v1513_v30 = vadd.f32 1.0, %v1512_v24  ;;  %vm1516_vm6 = vcmp.lt.f32.partialorder %v1515_v33, 0.0004427343 }
 0x232   :  { %v1508_v59 = vsel %vm1507_vm1, %v1505_v23, %v1502_v19 }
 0x233   :  { %v1518_v32 = vmul.f32 0.01, %v1508_v59  ;;  %v1514_v38 = vmul.f32 %v1564_v10, %v1513_v30 }
 0x235   :  { %v1520_v41 = vsel %vm1492_vm3, %v1848_v51, %v1518_v32 }
 0x290   :  { %v1463_v11 = vpop.xlane.xlu0 %1462 }
 0x291   :  { %v1466_v12 = vmax.f32 %v1463_v11, 1e-24 }
 0x293   :  { %1567 = vrsqrt.f32 %v1466_v12  ;;  %vm1474_vm4 = vweird.f32 %v1466_v12 }
 0x294   :  { %1569 = vtanh.f32 %v1522_v13 }
 0x295   :  { %1571 = vlog2.f32 %v1509_v15 }
 0x298   :  { %v1465_v20 = vpop.xlane.xlu0 %1464 }
 0x299   :  { %v1568_v21 = vpop.eup %1567  ;;  %v1467_v22 = vmax.f32 %v1465_v20, 1e-24 }
 0x29a   :  { %v1469_v25 = vmul.f32 %v1568_v21, %v1466_v12  ;;  %v1570_v27 = vpop.eup %1569  ;;  %vm1475_vm2 = vweird.f32 %v1568_v21 }
 0x29b   :  { %1573 = vrsqrt.f32 %v1467_v22  ;;  %v1572_v29 = vpop.eup %1571  ;;  %v1526_v34 = vadd.f32 1.0, %v1570_v27  ;;  %vm1476_vm7 = vmor %vm1474_vm4, %vm1475_vm2  ;;  %vm1484_vm10 = vweird.f32 %v1467_v22 }
 0x29c   :  { %v1470_v28 = vmul.f32 %v1568_v21, %v1469_v25  ;;  %1575 = vtanh.f32 %v1523_v26  ;;  %v1511_v35 = vmul.f32 0.6931472, %v1572_v29 }
 0x29d   :  { %v1528_v9 = vmul.f32 0.5, %v1526_v34 }
 0x29e   :  { %v1471_v31 = vmul.f32 0.5, %v1470_v28  ;;  %v1517_v42 = vsel %vm1516_vm6, %v1514_v38, %v1511_v35 }
 0x29f   :  { %v1532_v47 = vsel %vm1455_vm5, %v1520_v41, %v1528_v9  ;;  %v1519_v49 = vmul.f32 0.01, %v1517_v42 }
 0x2a0   :  { %v1472_v36 = vsub.f32 1.5, %v1471_v31 }
 0x2a1   :  { %v1574_v37 = vpop.eup %1573 }
 0x2a2   :  { %v1473_v39 = vmul.f32 %v1568_v21, %v1472_v36  ;;  %v1479_v40 = vmul.f32 %v1574_v37, %v1467_v22  ;;  %v1576_v45 = vpop.eup %1575  ;;  %vm1485_vm8 = vweird.f32 %v1574_v37 }
 0x2a3   :  { %v1527_v52 = vadd.f32 1.0, %v1576_v45  ;;  %vm1486_vm11 = vmor %vm1484_vm10, %vm1485_vm8 }
 0x2a4   :  { %v1477_v43 = vsel %vm1476_vm7, %v1568_v21, %v1473_v39  ;;  %v1480_v44 = vmul.f32 %v1574_v37, %v1479_v40 }
 0x2a5   :  { %v1488_v3 = vmul.f32 %v1477_v43, %v1848_v51  ;;  %v1521_v51 = vsel %vm1493_vm9, %v1855_v61, %v1519_v49  ;;  %v1529_v55 = vmul.f32 0.5, %v1527_v52 }
 0x2a6   :  { %v1481_v48 = vmul.f32 0.5, %v1480_v44 }
 0x2a7   :  { %v1534_v50 = vsel %vm1454_vm0, %v1488_v3, %v1532_v47  ;;  %v1533_v58 = vsel %vm1455_vm5, %v1521_v51, %v1529_v55 }
 0x2a8   :  { %1536 = vst [vmem:[%s1895_s7] sm:$0xff] %v1534_v50  ;;  %v1482_v53 = vsub.f32 1.5, %v1481_v48 }
 0x2aa   :  { %v1483_v54 = vmul.f32 %v1574_v37, %v1482_v53 }
 0x2ac   :  { %v1487_v56 = vsel %vm1486_vm11, %v1574_v37, %v1483_v54 }
 0x2ad   :  { %v1489_v57 = vmul.f32 %v1487_v56, %v1855_v61 }
 0x2af   :  { %v1535_v60 = vsel %vm1454_vm0, %v1489_v57, %v1533_v58 }
 0x2b0   :  { %1537 = vst [vmem:[%s1895_s7 + $0x8] sm:$0xff] %v1535_v60 }
 0x2b1   :  { %1542 = vsyncpa [#allocation3], 1 }
 0x2b2   :  { %1543 = vsyncpa [#allocation5], 1 }
 0x2b3   :  { %1544 = vsyncpa [#allocation8], 1 }
 0x2b4   :  { %1545 = vsyncpa [#allocation11], 1 }

</bundles_post_ra>
